<compile_context>
chip_gen: v6e
topology: v6e:2x2x1
jax: 0.10.0
libtpu: 0.0.40
codegen_flags: <defaults>
</compile_context>

<pallas_src>
import jax
import jax.numpy as jnp
from jax.experimental import pallas as pl
from jax.experimental.pallas import tpu as pltpu


def _round_up(x, m):
    return (x + m - 1) // m * m


def _pick_t_blk(T, max_blk=16):
    """Largest divisor of T that is <= max_blk (keeps time blocking exact)."""
    for cand in range(min(T, max_blk), 0, -1):
        if T % cand == 0:
            return cand
    return 1


def lstm_kernel(gx_ref, whh_ref, o_ref, h_ref, c_ref):
    """One grid step = T_BLK LSTM timesteps.

    gx_ref : (T_BLK, Bp, 4*Hp)  precomputed x @ W_ih + b (gate-lane-aligned)
    whh_ref: (Hp, 4*Hp)         recurrent weights (resident)
    o_ref  : (Bp, Hp)           final hidden state (lane-dense output)
    h_ref/c_ref : (Bp, Hp)      recurrent state, persists across grid steps
    """
    t = pl.program_id(0)

    @pl.when(t == 0)
    def _():
        h_ref[...] = jnp.zeros_like(h_ref)
        c_ref[...] = jnp.zeros_like(c_ref)

    t_blk = gx_ref.shape[0]
    hp = h_ref.shape[1]

    def step(s, carry):
        h, c = carry
        # Only the recurrence matmul lives in the serial loop.
        gates = gx_ref[s] + jnp.dot(h, whh_ref[...],
                                    preferred_element_type=jnp.float32)
        # Each gate is a whole 128-lane-aligned slab: no cross-lane extracts.
        i_g = jax.nn.sigmoid(gates[:, 0 * hp:1 * hp])
        f_g = jax.nn.sigmoid(gates[:, 1 * hp:2 * hp])
        g_g = jnp.tanh(gates[:, 2 * hp:3 * hp])
        o_g = jax.nn.sigmoid(gates[:, 3 * hp:4 * hp])
        c = f_g * c + i_g * g_g
        h = o_g * jnp.tanh(c)
        return (h, c)

    h, c = jax.lax.fori_loop(0, t_blk, step, (h_ref[...], c_ref[...]),
                             unroll=True)
    h_ref[...] = h
    c_ref[...] = c
    # Output block index is constant over the grid -> stays resident in VMEM
    # and is written back to HBM once at the end; last write wins.
    o_ref[...] = h


def rnn_forward(tokens, params):
    emb_table = params["emb"]          # (V, E), row 0 == 0 (padding_idx)
    w_ih = params["w_ih"]              # (E, 4H)   PyTorch gate order i|f|g|o
    w_hh = params["w_hh"]              # (H, 4H)
    b = params["b"]                    # (1, 4H)   b_ih + b_hh fused
    w_out = params["w_out"]            # (H, O)
    b_out = params["b_out"]            # (1, O)

    B, T = tokens.shape
    E = emb_table.shape[1]
    H = w_hh.shape[0]

    # Padded sizes: batch to the 8-sublane tile, hidden so that each gate
    # occupies its own multiple-of-128-lane slab.
    Bp = max(8, _round_up(B, 8))
    Hp = max(128, _round_up(H, 128))
    t_blk = _pick_t_blk(T)

    # --- glue: time-major gather (no big transpose), batch pad -------------
    x = jnp.take(emb_table, tokens.T, axis=0)                  # (T, B, E)
    x = jnp.pad(x, ((0, 0), (0, Bp - B), (0, 0)))              # (T, Bp, E)

    # Gate-lane-aligned weight layout: (., 4, H) -> pad H -> (., 4*Hp).
    w_ih_p = jnp.pad(w_ih.reshape(E, 4, H),
                     ((0, 0), (0, 0), (0, Hp - H))).reshape(E, 4 * Hp)
    w_hh_p = jnp.pad(w_hh.reshape(H, 4, H),
                     ((0, Hp - H), (0, 0), (0, Hp - H))).reshape(Hp, 4 * Hp)
    b_p = jnp.pad(b.reshape(4, H), ((0, 0), (0, Hp - H))).reshape(1, 4 * Hp)

    # --- hoisted input projection: one large (T*Bp, E)x(E, 4Hp) matmul -----
    gx = (x.reshape(T * Bp, E) @ w_ih_p + b_p).reshape(T, Bp, 4 * Hp)
    gx = gx.astype(jnp.float32)

    grid_spec = pltpu.PrefetchScalarGridSpec(
        num_scalar_prefetch=0,
        grid=(T // t_blk,),
        in_specs=[
            pl.BlockSpec((t_blk, Bp, 4 * Hp), lambda t: (t, 0, 0)),  # G_x chunk
            pl.BlockSpec((Hp, 4 * Hp), lambda t: (0, 0)),            # W_hh
        ],
        out_specs=pl.BlockSpec((Bp, Hp), lambda t: (0, 0)),
        scratch_shapes=[
            pltpu.VMEM((Bp, Hp), jnp.float32),   # h
            pltpu.VMEM((Bp, Hp), jnp.float32),   # c
        ],
    )

    h_final = pl.pallas_call(
        lstm_kernel,
        out_shape=jax.ShapeDtypeStruct((Bp, Hp), jnp.float32),
        grid_spec=grid_spec,
        compiler_params=pltpu.CompilerParams(
            dimension_semantics=("arbitrary",)),   # time is serial
    )(gx, w_hh_p)

    # Final (H, O=1) linear on the real rows/lanes only -- kept in XLA so the
    # kernel output stays lane-dense.
    return h_final[:B, :H] @ w_out + b_out


def init_params(key, num_embeddings, embedding_dim, hidden_size, output_size):
    k = jax.random.split(key, 7)
    bound = 1.0 / jnp.sqrt(hidden_size)
    emb = jax.random.normal(k[0], (num_embeddings, embedding_dim), jnp.float32)
    emb = emb.at[0].set(0.0)                                    # padding_idx=0
    w_ih = jax.random.uniform(k[1], (embedding_dim, 4 * hidden_size),
                              jnp.float32, -bound, bound)
    w_hh = jax.random.uniform(k[2], (hidden_size, 4 * hidden_size),
                              jnp.float32, -bound, bound)
    b_ih = jax.random.uniform(k[3], (4 * hidden_size,), jnp.float32, -bound, bound)
    b_hh = jax.random.uniform(k[4], (4 * hidden_size,), jnp.float32, -bound, bound)
    w_out = jax.random.uniform(k[5], (hidden_size, output_size),
                               jnp.float32, -bound, bound)
    b_out = jax.random.uniform(k[6], (output_size,), jnp.float32, -bound, bound)
    return {
        "emb": emb,
        "w_ih": w_ih,
        "w_hh": w_hh,
        "b": (b_ih + b_hh)[None, :],
        "w_out": w_out,
        "b_out": b_out[None, :],
    }


def rnn_reference(tokens, params):
    """Pure-JAX reference of the PyTorch forward (i|f|g|o gate order)."""
    x = jnp.take(params["emb"], tokens, axis=0)        # (B, T, E)
    B = x.shape[0]
    H = params["w_hh"].shape[0]
    h = jnp.zeros((B, H), jnp.float32)
    c = jnp.zeros((B, H), jnp.float32)

    def step(carry, x_t):
        h, c = carry
        gates = x_t @ params["w_ih"] + h @ params["w_hh"] + params["b"]
        i_g = jax.nn.sigmoid(gates[:, 0 * H:1 * H])
        f_g = jax.nn.sigmoid(gates[:, 1 * H:2 * H])
        g_g = jnp.tanh(gates[:, 2 * H:3 * H])
        o_g = jax.nn.sigmoid(gates[:, 3 * H:4 * H])
        c = f_g * c + i_g * g_g
        h = o_g * jnp.tanh(c)
        return (h, c), None

    (h, _), _ = jax.lax.scan(step, (h, c), jnp.transpose(x, (1, 0, 2)))
    return h @ params["w_out"] + params["b_out"]


if __name__ == "__main__":
    key = jax.random.PRNGKey(0)
    num_embeddings, embedding_dim, hidden_size, output_size = 100, 32, 32, 1
    B, T = 2, 8

    pkey, tkey = jax.random.split(key)
    params = init_params(pkey, num_embeddings, embedding_dim,
                         hidden_size, output_size)
    tokens = jax.random.randint(tkey, (B, T), 0, num_embeddings, dtype=jnp.int32)

    out = rnn_forward(tokens, params)
    out = jax.block_until_ready(out)

    ref = rnn_reference(tokens, params)
    assert out.shape == (B, output_size)
    assert jnp.allclose(out, ref, atol=1e-5, rtol=1e-5)

    print("KERNEL_OK")
</pallas_src>

<mosaic_0001>
module attributes {stable_mosaic.version = 11 : i64} {
  func.func @lstm_kernel(%arg0: i32, %arg1: memref<8x8x512xf32, #tpu.memory_space<vmem>>, %arg2: memref<128x512xf32, #tpu.memory_space<vmem>>, %arg3: memref<8x128xf32, #tpu.memory_space<vmem>>, %arg4: memref<8x128xf32, #tpu.memory_space<vmem>>, %arg5: memref<8x128xf32, #tpu.memory_space<vmem>>) attributes {dimension_semantics = [#tpu.dimension_semantics<arbitrary>], iteration_bounds = array<i64: 1>, scalar_prefetch = 0 : i64, scratch_operands = 2 : i64, tpu.core_type = #tpu.core_type<tc>, window_params = [{transform_indices = @transform_0, window_bounds = array<i64: 8, 8, 512>}, {pipeline_mode = #tpu.pipeline_mode<synchronous>, transform_indices = @transform_1, window_bounds = array<i64: 128, 512>}, {pipeline_mode = #tpu.pipeline_mode<synchronous>, transform_indices = @transform_2, window_bounds = array<i64: 8, 128>}]} {
    %c0_i32 = arith.constant 0 : i32
    %0 = arith.cmpi eq, %arg0, %c0_i32 : i32
    %1 = arith.extui %0 : i1 to i32
    %c0_i32_0 = arith.constant 0 : i32
    %2 = arith.cmpi ne, %1, %c0_i32_0 : i32
    scf.if %2 {
      %cst_74 = arith.constant 0.000000e+00 : f32
      %256 = vector.broadcast %cst_74 : f32 to vector<8x128xf32>
      %c0_75 = arith.constant 0 : index
      %c0_76 = arith.constant 0 : index
      %257 = vector.load %arg4[%c0_75, %c0_76] : memref<8x128xf32, #tpu.memory_space<vmem>>, vector<8x128xf32>
      tpu.vector_store %arg4[%c0_75, %c0_76], %256 {strides = array<i32>} : memref<8x128xf32, #tpu.memory_space<vmem>>, vector<8x128xf32>,
      %cst_77 = arith.constant 0.000000e+00 : f32
      %258 = vector.broadcast %cst_77 : f32 to vector<8x128xf32>
      %c0_78 = arith.constant 0 : index
      %c0_79 = arith.constant 0 : index
      %259 = vector.load %arg5[%c0_78, %c0_79] : memref<8x128xf32, #tpu.memory_space<vmem>>, vector<8x128xf32>
      tpu.vector_store %arg5[%c0_78, %c0_79], %258 {strides = array<i32>} : memref<8x128xf32, #tpu.memory_space<vmem>>, vector<8x128xf32>,
    } else {
    }
    %c0 = arith.constant 0 : index
    %c0_1 = arith.constant 0 : index
    %3 = vector.load %arg4[%c0, %c0_1] : memref<8x128xf32, #tpu.memory_space<vmem>>, vector<8x128xf32>
    %c0_2 = arith.constant 0 : index
    %c0_3 = arith.constant 0 : index
    %4 = vector.load %arg5[%c0_2, %c0_3] : memref<8x128xf32, #tpu.memory_space<vmem>>, vector<8x128xf32>
    %c0_i32_4 = arith.constant 0 : i32
    %5 = arith.index_cast %c0_i32_4 : i32 to index
    %c0_5 = arith.constant 0 : index
    %c0_6 = arith.constant 0 : index
    %6 = vector.load %arg1[%5, %c0_5, %c0_6] : memref<8x8x512xf32, #tpu.memory_space<vmem>>, vector<1x8x512xf32>
    %7 = vector.shape_cast %6 : vector<1x8x512xf32> to vector<8x512xf32>
    %c0_7 = arith.constant 0 : index
    %c0_8 = arith.constant 0 : index
    %8 = vector.load %arg2[%c0_7, %c0_8] : memref<128x512xf32, #tpu.memory_space<vmem>>, vector<128x512xf32>
    %cst = arith.constant dense<0.000000e+00> : vector<8x512xf32>
    %9 = tpu.matmul %3, %8, %cst {dimension_numbers = #tpu.dot_dimension_numbers<[1], [0], [0], [1], [0, 0, 1, 1], [], []>} : vector<8x128xf32>, vector<128x512xf32>, vector<8x512xf32> -> vector<8x512xf32>
    %10 = arith.addf %7, %9 : vector<8x512xf32>
    %11 = vector.extract_strided_slice %10 {offsets = [0, 0], sizes = [8, 128], strides = [1, 1]} : vector<8x512xf32> to vector<8x128xf32>
    %12 = arith.negf %11 : vector<8x128xf32>
    %13 = math.exp %12 : vector<8x128xf32>
    %cst_9 = arith.constant 1.000000e+00 : f32
    %14 = vector.broadcast %cst_9 : f32 to vector<8x128xf32>
    %15 = arith.addf %14, %13 : vector<8x128xf32>
    %16 = arith.divf %14, %15 : vector<8x128xf32>
    %17 = vector.extract_strided_slice %10 {offsets = [0, 128], sizes = [8, 128], strides = [1, 1]} : vector<8x512xf32> to vector<8x128xf32>
    %18 = arith.negf %17 : vector<8x128xf32>
    %19 = math.exp %18 : vector<8x128xf32>
    %cst_10 = arith.constant 1.000000e+00 : f32
    %20 = vector.broadcast %cst_10 : f32 to vector<8x128xf32>
    %21 = arith.addf %20, %19 : vector<8x128xf32>
    %22 = arith.divf %20, %21 : vector<8x128xf32>
    %23 = vector.extract_strided_slice %10 {offsets = [0, 256], sizes = [8, 128], strides = [1, 1]} : vector<8x512xf32> to vector<8x128xf32>
    %24 = math.tanh %23 : vector<8x128xf32>
    %25 = vector.extract_strided_slice %10 {offsets = [0, 384], sizes = [8, 128], strides = [1, 1]} : vector<8x512xf32> to vector<8x128xf32>
    %26 = arith.negf %25 : vector<8x128xf32>
    %27 = math.exp %26 : vector<8x128xf32>
    %cst_11 = arith.constant 1.000000e+00 : f32
    %28 = vector.broadcast %cst_11 : f32 to vector<8x128xf32>
    %29 = arith.addf %28, %27 : vector<8x128xf32>
    %30 = arith.divf %28, %29 : vector<8x128xf32>
    %31 = arith.mulf %22, %4 : vector<8x128xf32>
    %32 = arith.mulf %16, %24 : vector<8x128xf32>
    %33 = arith.addf %31, %32 : vector<8x128xf32>
    %34 = math.tanh %33 : vector<8x128xf32>
    %35 = arith.mulf %30, %34 : vector<8x128xf32>
    %c1_i32 = arith.constant 1 : i32
    %36 = arith.index_cast %c1_i32 : i32 to index
    %c0_12 = arith.constant 0 : index
    %c0_13 = arith.constant 0 : index
    %37 = vector.load %arg1[%36, %c0_12, %c0_13] : memref<8x8x512xf32, #tpu.memory_space<vmem>>, vector<1x8x512xf32>
    %38 = vector.shape_cast %37 : vector<1x8x512xf32> to vector<8x512xf32>
    %c0_14 = arith.constant 0 : index
    %c0_15 = arith.constant 0 : index
    %39 = vector.load %arg2[%c0_14, %c0_15] : memref<128x512xf32, #tpu.memory_space<vmem>>, vector<128x512xf32>
    %cst_16 = arith.constant dense<0.000000e+00> : vector<8x512xf32>
    %40 = tpu.matmul %35, %39, %cst_16 {dimension_numbers = #tpu.dot_dimension_numbers<[1], [0], [0], [1], [0, 0, 1, 1], [], []>} : vector<8x128xf32>, vector<128x512xf32>, vector<8x512xf32> -> vector<8x512xf32>
    %41 = arith.addf %38, %40 : vector<8x512xf32>
    %42 = vector.extract_strided_slice %41 {offsets = [0, 0], sizes = [8, 128], strides = [1, 1]} : vector<8x512xf32> to vector<8x128xf32>
    %43 = arith.negf %42 : vector<8x128xf32>
    %44 = math.exp %43 : vector<8x128xf32>
    %cst_17 = arith.constant 1.000000e+00 : f32
    %45 = vector.broadcast %cst_17 : f32 to vector<8x128xf32>
    %46 = arith.addf %45, %44 : vector<8x128xf32>
    %47 = arith.divf %45, %46 : vector<8x128xf32>
    %48 = vector.extract_strided_slice %41 {offsets = [0, 128], sizes = [8, 128], strides = [1, 1]} : vector<8x512xf32> to vector<8x128xf32>
    %49 = arith.negf %48 : vector<8x128xf32>
    %50 = math.exp %49 : vector<8x128xf32>
    %cst_18 = arith.constant 1.000000e+00 : f32
    %51 = vector.broadcast %cst_18 : f32 to vector<8x128xf32>
    %52 = arith.addf %51, %50 : vector<8x128xf32>
    %53 = arith.divf %51, %52 : vector<8x128xf32>
    %54 = vector.extract_strided_slice %41 {offsets = [0, 256], sizes = [8, 128], strides = [1, 1]} : vector<8x512xf32> to vector<8x128xf32>
    %55 = math.tanh %54 : vector<8x128xf32>
    %56 = vector.extract_strided_slice %41 {offsets = [0, 384], sizes = [8, 128], strides = [1, 1]} : vector<8x512xf32> to vector<8x128xf32>
    %57 = arith.negf %56 : vector<8x128xf32>
    %58 = math.exp %57 : vector<8x128xf32>
    %cst_19 = arith.constant 1.000000e+00 : f32
    %59 = vector.broadcast %cst_19 : f32 to vector<8x128xf32>
    %60 = arith.addf %59, %58 : vector<8x128xf32>
    %61 = arith.divf %59, %60 : vector<8x128xf32>
    %62 = arith.mulf %53, %33 : vector<8x128xf32>
    %63 = arith.mulf %47, %55 : vector<8x128xf32>
    %64 = arith.addf %62, %63 : vector<8x128xf32>
    %65 = math.tanh %64 : vector<8x128xf32>
    %66 = arith.mulf %61, %65 : vector<8x128xf32>
    %c2_i32 = arith.constant 2 : i32
    %67 = arith.index_cast %c2_i32 : i32 to index
    %c0_20 = arith.constant 0 : index
    %c0_21 = arith.constant 0 : index
    %68 = vector.load %arg1[%67, %c0_20, %c0_21] : memref<8x8x512xf32, #tpu.memory_space<vmem>>, vector<1x8x512xf32>
    %69 = vector.shape_cast %68 : vector<1x8x512xf32> to vector<8x512xf32>
    %c0_22 = arith.constant 0 : index
    %c0_23 = arith.constant 0 : index
    %70 = vector.load %arg2[%c0_22, %c0_23] : memref<128x512xf32, #tpu.memory_space<vmem>>, vector<128x512xf32>
    %cst_24 = arith.constant dense<0.000000e+00> : vector<8x512xf32>
    %71 = tpu.matmul %66, %70, %cst_24 {dimension_numbers = #tpu.dot_dimension_numbers<[1], [0], [0], [1], [0, 0, 1, 1], [], []>} : vector<8x128xf32>, vector<128x512xf32>, vector<8x512xf32> -> vector<8x512xf32>
    %72 = arith.addf %69, %71 : vector<8x512xf32>
    %73 = vector.extract_strided_slice %72 {offsets = [0, 0], sizes = [8, 128], strides = [1, 1]} : vector<8x512xf32> to vector<8x128xf32>
    %74 = arith.negf %73 : vector<8x128xf32>
    %75 = math.exp %74 : vector<8x128xf32>
    %cst_25 = arith.constant 1.000000e+00 : f32
    %76 = vector.broadcast %cst_25 : f32 to vector<8x128xf32>
    %77 = arith.addf %76, %75 : vector<8x128xf32>
    %78 = arith.divf %76, %77 : vector<8x128xf32>
    %79 = vector.extract_strided_slice %72 {offsets = [0, 128], sizes = [8, 128], strides = [1, 1]} : vector<8x512xf32> to vector<8x128xf32>
    %80 = arith.negf %79 : vector<8x128xf32>
    %81 = math.exp %80 : vector<8x128xf32>
    %cst_26 = arith.constant 1.000000e+00 : f32
    %82 = vector.broadcast %cst_26 : f32 to vector<8x128xf32>
    %83 = arith.addf %82, %81 : vector<8x128xf32>
    %84 = arith.divf %82, %83 : vector<8x128xf32>
    %85 = vector.extract_strided_slice %72 {offsets = [0, 256], sizes = [8, 128], strides = [1, 1]} : vector<8x512xf32> to vector<8x128xf32>
    %86 = math.tanh %85 : vector<8x128xf32>
    %87 = vector.extract_strided_slice %72 {offsets = [0, 384], sizes = [8, 128], strides = [1, 1]} : vector<8x512xf32> to vector<8x128xf32>
    %88 = arith.negf %87 : vector<8x128xf32>
    %89 = math.exp %88 : vector<8x128xf32>
    %cst_27 = arith.constant 1.000000e+00 : f32
    %90 = vector.broadcast %cst_27 : f32 to vector<8x128xf32>
    %91 = arith.addf %90, %89 : vector<8x128xf32>
    %92 = arith.divf %90, %91 : vector<8x128xf32>
    %93 = arith.mulf %84, %64 : vector<8x128xf32>
    %94 = arith.mulf %78, %86 : vector<8x128xf32>
    %95 = arith.addf %93, %94 : vector<8x128xf32>
    %96 = math.tanh %95 : vector<8x128xf32>
    %97 = arith.mulf %92, %96 : vector<8x128xf32>
    %c3_i32 = arith.constant 3 : i32
    %98 = arith.index_cast %c3_i32 : i32 to index
    %c0_28 = arith.constant 0 : index
    %c0_29 = arith.constant 0 : index
    %99 = vector.load %arg1[%98, %c0_28, %c0_29] : memref<8x8x512xf32, #tpu.memory_space<vmem>>, vector<1x8x512xf32>
    %100 = vector.shape_cast %99 : vector<1x8x512xf32> to vector<8x512xf32>
    %c0_30 = arith.constant 0 : index
    %c0_31 = arith.constant 0 : index
    %101 = vector.load %arg2[%c0_30, %c0_31] : memref<128x512xf32, #tpu.memory_space<vmem>>, vector<128x512xf32>
    %cst_32 = arith.constant dense<0.000000e+00> : vector<8x512xf32>
    %102 = tpu.matmul %97, %101, %cst_32 {dimension_numbers = #tpu.dot_dimension_numbers<[1], [0], [0], [1], [0, 0, 1, 1], [], []>} : vector<8x128xf32>, vector<128x512xf32>, vector<8x512xf32> -> vector<8x512xf32>
    %103 = arith.addf %100, %102 : vector<8x512xf32>
    %104 = vector.extract_strided_slice %103 {offsets = [0, 0], sizes = [8, 128], strides = [1, 1]} : vector<8x512xf32> to vector<8x128xf32>
    %105 = arith.negf %104 : vector<8x128xf32>
    %106 = math.exp %105 : vector<8x128xf32>
    %cst_33 = arith.constant 1.000000e+00 : f32
    %107 = vector.broadcast %cst_33 : f32 to vector<8x128xf32>
    %108 = arith.addf %107, %106 : vector<8x128xf32>
    %109 = arith.divf %107, %108 : vector<8x128xf32>
    %110 = vector.extract_strided_slice %103 {offsets = [0, 128], sizes = [8, 128], strides = [1, 1]} : vector<8x512xf32> to vector<8x128xf32>
    %111 = arith.negf %110 : vector<8x128xf32>
    %112 = math.exp %111 : vector<8x128xf32>
    %cst_34 = arith.constant 1.000000e+00 : f32
    %113 = vector.broadcast %cst_34 : f32 to vector<8x128xf32>
    %114 = arith.addf %113, %112 : vector<8x128xf32>
    %115 = arith.divf %113, %114 : vector<8x128xf32>
    %116 = vector.extract_strided_slice %103 {offsets = [0, 256], sizes = [8, 128], strides = [1, 1]} : vector<8x512xf32> to vector<8x128xf32>
    %117 = math.tanh %116 : vector<8x128xf32>
    %118 = vector.extract_strided_slice %103 {offsets = [0, 384], sizes = [8, 128], strides = [1, 1]} : vector<8x512xf32> to vector<8x128xf32>
    %119 = arith.negf %118 : vector<8x128xf32>
    %120 = math.exp %119 : vector<8x128xf32>
    %cst_35 = arith.constant 1.000000e+00 : f32
    %121 = vector.broadcast %cst_35 : f32 to vector<8x128xf32>
    %122 = arith.addf %121, %120 : vector<8x128xf32>
    %123 = arith.divf %121, %122 : vector<8x128xf32>
    %124 = arith.mulf %115, %95 : vector<8x128xf32>
    %125 = arith.mulf %109, %117 : vector<8x128xf32>
    %126 = arith.addf %124, %125 : vector<8x128xf32>
    %127 = math.tanh %126 : vector<8x128xf32>
    %128 = arith.mulf %123, %127 : vector<8x128xf32>
    %c4_i32 = arith.constant 4 : i32
    %129 = arith.index_cast %c4_i32 : i32 to index
    %c0_36 = arith.constant 0 : index
    %c0_37 = arith.constant 0 : index
    %130 = vector.load %arg1[%129, %c0_36, %c0_37] : memref<8x8x512xf32, #tpu.memory_space<vmem>>, vector<1x8x512xf32>
    %131 = vector.shape_cast %130 : vector<1x8x512xf32> to vector<8x512xf32>
    %c0_38 = arith.constant 0 : index
    %c0_39 = arith.constant 0 : index
    %132 = vector.load %arg2[%c0_38, %c0_39] : memref<128x512xf32, #tpu.memory_space<vmem>>, vector<128x512xf32>
    %cst_40 = arith.constant dense<0.000000e+00> : vector<8x512xf32>
    %133 = tpu.matmul %128, %132, %cst_40 {dimension_numbers = #tpu.dot_dimension_numbers<[1], [0], [0], [1], [0, 0, 1, 1], [], []>} : vector<8x128xf32>, vector<128x512xf32>, vector<8x512xf32> -> vector<8x512xf32>
    %134 = arith.addf %131, %133 : vector<8x512xf32>
    %135 = vector.extract_strided_slice %134 {offsets = [0, 0], sizes = [8, 128], strides = [1, 1]} : vector<8x512xf32> to vector<8x128xf32>
    %136 = arith.negf %135 : vector<8x128xf32>
    %137 = math.exp %136 : vector<8x128xf32>
    %cst_41 = arith.constant 1.000000e+00 : f32
    %138 = vector.broadcast %cst_41 : f32 to vector<8x128xf32>
    %139 = arith.addf %138, %137 : vector<8x128xf32>
    %140 = arith.divf %138, %139 : vector<8x128xf32>
    %141 = vector.extract_strided_slice %134 {offsets = [0, 128], sizes = [8, 128], strides = [1, 1]} : vector<8x512xf32> to vector<8x128xf32>
    %142 = arith.negf %141 : vector<8x128xf32>
    %143 = math.exp %142 : vector<8x128xf32>
    %cst_42 = arith.constant 1.000000e+00 : f32
    %144 = vector.broadcast %cst_42 : f32 to vector<8x128xf32>
    %145 = arith.addf %144, %143 : vector<8x128xf32>
    %146 = arith.divf %144, %145 : vector<8x128xf32>
    %147 = vector.extract_strided_slice %134 {offsets = [0, 256], sizes = [8, 128], strides = [1, 1]} : vector<8x512xf32> to vector<8x128xf32>
    %148 = math.tanh %147 : vector<8x128xf32>
    %149 = vector.extract_strided_slice %134 {offsets = [0, 384], sizes = [8, 128], strides = [1, 1]} : vector<8x512xf32> to vector<8x128xf32>
    %150 = arith.negf %149 : vector<8x128xf32>
    %151 = math.exp %150 : vector<8x128xf32>
    %cst_43 = arith.constant 1.000000e+00 : f32
    %152 = vector.broadcast %cst_43 : f32 to vector<8x128xf32>
    %153 = arith.addf %152, %151 : vector<8x128xf32>
    %154 = arith.divf %152, %153 : vector<8x128xf32>
    %155 = arith.mulf %146, %126 : vector<8x128xf32>
    %156 = arith.mulf %140, %148 : vector<8x128xf32>
    %157 = arith.addf %155, %156 : vector<8x128xf32>
    %158 = math.tanh %157 : vector<8x128xf32>
    %159 = arith.mulf %154, %158 : vector<8x128xf32>
    %c5_i32 = arith.constant 5 : i32
    %160 = arith.index_cast %c5_i32 : i32 to index
    %c0_44 = arith.constant 0 : index
    %c0_45 = arith.constant 0 : index
    %161 = vector.load %arg1[%160, %c0_44, %c0_45] : memref<8x8x512xf32, #tpu.memory_space<vmem>>, vector<1x8x512xf32>
    %162 = vector.shape_cast %161 : vector<1x8x512xf32> to vector<8x512xf32>
    %c0_46 = arith.constant 0 : index
    %c0_47 = arith.constant 0 : index
    %163 = vector.load %arg2[%c0_46, %c0_47] : memref<128x512xf32, #tpu.memory_space<vmem>>, vector<128x512xf32>
    %cst_48 = arith.constant dense<0.000000e+00> : vector<8x512xf32>
    %164 = tpu.matmul %159, %163, %cst_48 {dimension_numbers = #tpu.dot_dimension_numbers<[1], [0], [0], [1], [0, 0, 1, 1], [], []>} : vector<8x128xf32>, vector<128x512xf32>, vector<8x512xf32> -> vector<8x512xf32>
    %165 = arith.addf %162, %164 : vector<8x512xf32>
    %166 = vector.extract_strided_slice %165 {offsets = [0, 0], sizes = [8, 128], strides = [1, 1]} : vector<8x512xf32> to vector<8x128xf32>
    %167 = arith.negf %166 : vector<8x128xf32>
    %168 = math.exp %167 : vector<8x128xf32>
    %cst_49 = arith.constant 1.000000e+00 : f32
    %169 = vector.broadcast %cst_49 : f32 to vector<8x128xf32>
    %170 = arith.addf %169, %168 : vector<8x128xf32>
    %171 = arith.divf %169, %170 : vector<8x128xf32>
    %172 = vector.extract_strided_slice %165 {offsets = [0, 128], sizes = [8, 128], strides = [1, 1]} : vector<8x512xf32> to vector<8x128xf32>
    %173 = arith.negf %172 : vector<8x128xf32>
    %174 = math.exp %173 : vector<8x128xf32>
    %cst_50 = arith.constant 1.000000e+00 : f32
    %175 = vector.broadcast %cst_50 : f32 to vector<8x128xf32>
    %176 = arith.addf %175, %174 : vector<8x128xf32>
    %177 = arith.divf %175, %176 : vector<8x128xf32>
    %178 = vector.extract_strided_slice %165 {offsets = [0, 256], sizes = [8, 128], strides = [1, 1]} : vector<8x512xf32> to vector<8x128xf32>
    %179 = math.tanh %178 : vector<8x128xf32>
    %180 = vector.extract_strided_slice %165 {offsets = [0, 384], sizes = [8, 128], strides = [1, 1]} : vector<8x512xf32> to vector<8x128xf32>
    %181 = arith.negf %180 : vector<8x128xf32>
    %182 = math.exp %181 : vector<8x128xf32>
    %cst_51 = arith.constant 1.000000e+00 : f32
    %183 = vector.broadcast %cst_51 : f32 to vector<8x128xf32>
    %184 = arith.addf %183, %182 : vector<8x128xf32>
    %185 = arith.divf %183, %184 : vector<8x128xf32>
    %186 = arith.mulf %177, %157 : vector<8x128xf32>
    %187 = arith.mulf %171, %179 : vector<8x128xf32>
    %188 = arith.addf %186, %187 : vector<8x128xf32>
    %189 = math.tanh %188 : vector<8x128xf32>
    %190 = arith.mulf %185, %189 : vector<8x128xf32>
    %c6_i32 = arith.constant 6 : i32
    %191 = arith.index_cast %c6_i32 : i32 to index
    %c0_52 = arith.constant 0 : index
    %c0_53 = arith.constant 0 : index
    %192 = vector.load %arg1[%191, %c0_52, %c0_53] : memref<8x8x512xf32, #tpu.memory_space<vmem>>, vector<1x8x512xf32>
    %193 = vector.shape_cast %192 : vector<1x8x512xf32> to vector<8x512xf32>
    %c0_54 = arith.constant 0 : index
    %c0_55 = arith.constant 0 : index
    %194 = vector.load %arg2[%c0_54, %c0_55] : memref<128x512xf32, #tpu.memory_space<vmem>>, vector<128x512xf32>
    %cst_56 = arith.constant dense<0.000000e+00> : vector<8x512xf32>
    %195 = tpu.matmul %190, %194, %cst_56 {dimension_numbers = #tpu.dot_dimension_numbers<[1], [0], [0], [1], [0, 0, 1, 1], [], []>} : vector<8x128xf32>, vector<128x512xf32>, vector<8x512xf32> -> vector<8x512xf32>
    %196 = arith.addf %193, %195 : vector<8x512xf32>
    %197 = vector.extract_strided_slice %196 {offsets = [0, 0], sizes = [8, 128], strides = [1, 1]} : vector<8x512xf32> to vector<8x128xf32>
    %198 = arith.negf %197 : vector<8x128xf32>
    %199 = math.exp %198 : vector<8x128xf32>
    %cst_57 = arith.constant 1.000000e+00 : f32
    %200 = vector.broadcast %cst_57 : f32 to vector<8x128xf32>
    %201 = arith.addf %200, %199 : vector<8x128xf32>
    %202 = arith.divf %200, %201 : vector<8x128xf32>
    %203 = vector.extract_strided_slice %196 {offsets = [0, 128], sizes = [8, 128], strides = [1, 1]} : vector<8x512xf32> to vector<8x128xf32>
    %204 = arith.negf %203 : vector<8x128xf32>
    %205 = math.exp %204 : vector<8x128xf32>
    %cst_58 = arith.constant 1.000000e+00 : f32
    %206 = vector.broadcast %cst_58 : f32 to vector<8x128xf32>
    %207 = arith.addf %206, %205 : vector<8x128xf32>
    %208 = arith.divf %206, %207 : vector<8x128xf32>
    %209 = vector.extract_strided_slice %196 {offsets = [0, 256], sizes = [8, 128], strides = [1, 1]} : vector<8x512xf32> to vector<8x128xf32>
    %210 = math.tanh %209 : vector<8x128xf32>
    %211 = vector.extract_strided_slice %196 {offsets = [0, 384], sizes = [8, 128], strides = [1, 1]} : vector<8x512xf32> to vector<8x128xf32>
    %212 = arith.negf %211 : vector<8x128xf32>
    %213 = math.exp %212 : vector<8x128xf32>
    %cst_59 = arith.constant 1.000000e+00 : f32
    %214 = vector.broadcast %cst_59 : f32 to vector<8x128xf32>
    %215 = arith.addf %214, %213 : vector<8x128xf32>
    %216 = arith.divf %214, %215 : vector<8x128xf32>
    %217 = arith.mulf %208, %188 : vector<8x128xf32>
    %218 = arith.mulf %202, %210 : vector<8x128xf32>
    %219 = arith.addf %217, %218 : vector<8x128xf32>
    %220 = math.tanh %219 : vector<8x128xf32>
    %221 = arith.mulf %216, %220 : vector<8x128xf32>
    %c7_i32 = arith.constant 7 : i32
    %222 = arith.index_cast %c7_i32 : i32 to index
    %c0_60 = arith.constant 0 : index
    %c0_61 = arith.constant 0 : index
    %223 = vector.load %arg1[%222, %c0_60, %c0_61] : memref<8x8x512xf32, #tpu.memory_space<vmem>>, vector<1x8x512xf32>
    %224 = vector.shape_cast %223 : vector<1x8x512xf32> to vector<8x512xf32>
    %c0_62 = arith.constant 0 : index
    %c0_63 = arith.constant 0 : index
    %225 = vector.load %arg2[%c0_62, %c0_63] : memref<128x512xf32, #tpu.memory_space<vmem>>, vector<128x512xf32>
    %cst_64 = arith.constant dense<0.000000e+00> : vector<8x512xf32>
    %226 = tpu.matmul %221, %225, %cst_64 {dimension_numbers = #tpu.dot_dimension_numbers<[1], [0], [0], [1], [0, 0, 1, 1], [], []>} : vector<8x128xf32>, vector<128x512xf32>, vector<8x512xf32> -> vector<8x512xf32>
    %227 = arith.addf %224, %226 : vector<8x512xf32>
    %228 = vector.extract_strided_slice %227 {offsets = [0, 0], sizes = [8, 128], strides = [1, 1]} : vector<8x512xf32> to vector<8x128xf32>
    %229 = arith.negf %228 : vector<8x128xf32>
    %230 = math.exp %229 : vector<8x128xf32>
    %cst_65 = arith.constant 1.000000e+00 : f32
    %231 = vector.broadcast %cst_65 : f32 to vector<8x128xf32>
    %232 = arith.addf %231, %230 : vector<8x128xf32>
    %233 = arith.divf %231, %232 : vector<8x128xf32>
    %234 = vector.extract_strided_slice %227 {offsets = [0, 128], sizes = [8, 128], strides = [1, 1]} : vector<8x512xf32> to vector<8x128xf32>
    %235 = arith.negf %234 : vector<8x128xf32>
    %236 = math.exp %235 : vector<8x128xf32>
    %cst_66 = arith.constant 1.000000e+00 : f32
    %237 = vector.broadcast %cst_66 : f32 to vector<8x128xf32>
    %238 = arith.addf %237, %236 : vector<8x128xf32>
    %239 = arith.divf %237, %238 : vector<8x128xf32>
    %240 = vector.extract_strided_slice %227 {offsets = [0, 256], sizes = [8, 128], strides = [1, 1]} : vector<8x512xf32> to vector<8x128xf32>
    %241 = math.tanh %240 : vector<8x128xf32>
    %242 = vector.extract_strided_slice %227 {offsets = [0, 384], sizes = [8, 128], strides = [1, 1]} : vector<8x512xf32> to vector<8x128xf32>
    %243 = arith.negf %242 : vector<8x128xf32>
    %244 = math.exp %243 : vector<8x128xf32>
    %cst_67 = arith.constant 1.000000e+00 : f32
    %245 = vector.broadcast %cst_67 : f32 to vector<8x128xf32>
    %246 = arith.addf %245, %244 : vector<8x128xf32>
    %247 = arith.divf %245, %246 : vector<8x128xf32>
    %248 = arith.mulf %239, %219 : vector<8x128xf32>
    %249 = arith.mulf %233, %241 : vector<8x128xf32>
    %250 = arith.addf %248, %249 : vector<8x128xf32>
    %251 = math.tanh %250 : vector<8x128xf32>
    %252 = arith.mulf %247, %251 : vector<8x128xf32>
    %c8_i32 = arith.constant 8 : i32
    %c0_68 = arith.constant 0 : index
    %c0_69 = arith.constant 0 : index
    %253 = vector.load %arg4[%c0_68, %c0_69] : memref<8x128xf32, #tpu.memory_space<vmem>>, vector<8x128xf32>
    tpu.vector_store %arg4[%c0_68, %c0_69], %252 {strides = array<i32>} : memref<8x128xf32, #tpu.memory_space<vmem>>, vector<8x128xf32>,
    %c0_70 = arith.constant 0 : index
    %c0_71 = arith.constant 0 : index
    %254 = vector.load %arg5[%c0_70, %c0_71] : memref<8x128xf32, #tpu.memory_space<vmem>>, vector<8x128xf32>
    tpu.vector_store %arg5[%c0_70, %c0_71], %250 {strides = array<i32>} : memref<8x128xf32, #tpu.memory_space<vmem>>, vector<8x128xf32>,
    %c0_72 = arith.constant 0 : index
    %c0_73 = arith.constant 0 : index
    %255 = vector.load %arg3[%c0_72, %c0_73] : memref<8x128xf32, #tpu.memory_space<vmem>>, vector<8x128xf32>
    tpu.vector_store %arg3[%c0_72, %c0_73], %252 {strides = array<i32>} : memref<8x128xf32, #tpu.memory_space<vmem>>, vector<8x128xf32>,
    return
  }
  func.func @transform_0(%arg0: i32) -> (i32, i32, i32) {
    %c0_i32 = arith.constant 0 : i32
    %c0_i32_0 = arith.constant 0 : i32
    %c0_i32_1 = arith.constant 0 : i32
    return %arg0, %c0_i32, %c0_i32_0 : i32, i32, i32
  }
  func.func @transform_1(%arg0: i32) -> (i32, i32) {
    %c0_i32 = arith.constant 0 : i32
    %c0_i32_0 = arith.constant 0 : i32
    %c0_i32_1 = arith.constant 0 : i32
    return %c0_i32, %c0_i32_0 : i32, i32
  }
  func.func @transform_2(%arg0: i32) -> (i32, i32) {
    %c0_i32 = arith.constant 0 : i32
    %c0_i32_0 = arith.constant 0 : i32
    %c0_i32_1 = arith.constant 0 : i32
    return %c0_i32, %c0_i32_0 : i32, i32
  }
}

</mosaic_0001>

<bundles_post_ra>
// kernel: tpu_custom_call.1
= control target key start
LH: loop header
LB: loop body
LE: loop exit
PB: predicated region body
PF: predicated region fallthrough
CT: control target
= control target key end

     0   :  { %7 = vsyncpa [#allocation5], 0  ;;  %s2658_s0 = inlined_call_operand.hbm [shape: f32[8,8,512], index: 0, kind: input, shape index: {}]   ;;  %s2659_s1 = inlined_call_operand.hbm [shape: f32[128,512], index: 1, kind: input, shape index: {}]   ;;  %s2660_s2 = inlined_call_operand.hbm [shape: f32[8,128], index: 2, kind: output, shape index: {}]  }
   0x1   :  { %8 = vsyncpa [#allocation8], 0 }
   0x2   :  { %9 = vsyncpa [#allocation6], 0  ;;  %s1818_s9 = smov [#allocation4]  }
   0x3   :  { %s15_s10 = sshll.u32 %s1818_s9, 4  ;;  %s16_s10 = int_to_ptr.vmem [resolvable:$true] %s15_s10 }
   0x4   :  { %s1760_s11 = scalar_lea.vmem %s16_s10, 4096  ;;  %p1765_p1 = scmp.lt.s32.totalorder %s16_s10, %s16_s10 }
   0x5   :  { %p1761_p0 = scmp.ne.s32.totalorder %s16_s10, %s1760_s11  ;;  %p1766_p2 = scmp.lt.s32.totalorder %s1760_s11, %s1760_s11 }
   0x7   :  { %p1767_p3 = por %p1766_p2, %p1765_p1 }
   0x9   :  { %p1768_p4 = pnand %p1767_p3, %p1761_p0 }
   0xb   :  { %1771 = shalt.err (!%p1768_p4)
}
   0xc   :  { %s1819_s12 = smov 512   ;;  %s1820_s13 = smov 32  }
   0xd   :  { %21 = dma.hbm_to_vmem [thread:$0]  %s2658_s0, 4096, %s16_s10, [#allocation5], %s1819_s12, %s1819_s12, %s1820_s13  }
   0xe   :  { %s1821_s16 = smov [#allocation7]  }
   0xf   :  { %s27_s17 = sshll.u32 %s1821_s16, 4  ;;  %s28_s17 = int_to_ptr.vmem [resolvable:$true] %s27_s17 }
  0x10   :  { %s1780_s18 = scalar_lea.vmem %s28_s17, 8192  ;;  %p1785_p6 = scmp.lt.s32.totalorder %s28_s17, %s28_s17 }
  0x11   :  { %p1781_p5 = scmp.ne.s32.totalorder %s28_s17, %s1780_s18  ;;  %p1786_p7 = scmp.lt.s32.totalorder %s1780_s18, %s1780_s18 }
  0x13   :  { %p1787_p8 = por %p1786_p7, %p1785_p6 }
  0x15   :  { %p1788_p9 = pnand %p1787_p8, %p1781_p5 }
  0x17   :  { %1791 = shalt.err (!%p1788_p9)
}
  0x18   :  { %33 = dma.hbm_to_vmem [thread:$0]  %s2659_s1, 8192, %s28_s17, [#allocation8], %s1819_s12, %s1819_s12, %s1820_s13  }
  0x19   :  { %1812 = dma.done.wait [#allocation5], 4096  }
  0x1a   :  { %1813 = vsyncadd [#allocation5], 4294963200 }
  0x1b   :  { %1814 = dma.done.wait [#allocation8], 8192  }
  0x1c   :  { %1815 = vsyncadd [#allocation8], 4294959104  ;;  %v2663_v0 = vmov 0.0   ;;  %v1847_v1 = vld [vmem:[#allocation7 + $0x1e8] sm:$0xff]  ;;  %v1849_v2 = vld [vmem:[#allocation7 + $0x1e0] sm:$0xff]  ;;  %s1823_s0 = smov [#allocation9]  }
  0x1d   :  { %180 = vmatprep.mubr.f32.mxu0 %v2663_v0  ;;  %251 = vmatprep.mubr.f32.mxu1 %v2663_v0  ;;  %2730 = vst [vmem:[#allocation13_spill] sm:$0xff] %v1847_v1  ;;  %v1851_v3 = vld [vmem:[#allocation7 + $0x1c8] sm:$0xff]  ;;  %v1854_v4 = vld [vmem:[#allocation7 + $0x1c0] sm:$0xff]  ;;  %v1868_v9 = vld [vmem:[#allocation7 + $0x1f8] sm:$0xff]  ;;  %s1520_s1 = sshll.u32 %s1823_s0, 4  ;;  %s1521_s1 = int_to_ptr.vmem [resolvable:$true] %s1520_s1 }
  0x1e   :  { %116 = vmatprep.subr.mxu0 %v1847_v1  ;;  %v1857_v5 = vld [vmem:[#allocation7 + $0x1a8] sm:$0xff]  ;;  %v1860_v6 = vld [vmem:[#allocation7 + $0x1a0] sm:$0xff]  ;;  %2731 = vst [vmem:[#allocation14_spill] sm:$0xff] %v1868_v9  ;;  %187 = vmatprep.subr.mxu1 %v1868_v9  ;;  %v1874_v11 = vld [vmem:[#allocation7 + $0x1f0] sm:$0xff]  ;;  %s1792_s21 = scalar_lea.vmem %s1521_s1, 128  ;;  %p1797_p11 = scmp.lt.s32.totalorder %s1521_s1, %s1521_s1 }
  0x1f   :  { %117 = vmatpush1.msra.mxu0 %v1849_v2  ;;  %v1863_v7 = vld [vmem:[#allocation7 + $0x188] sm:$0xff]  ;;  %v1866_v8 = vld [vmem:[#allocation7 + $0x180] sm:$0xff]  ;;  %188 = vmatpush1.msra.mxu1 %v1874_v11  ;;  %v1880_v13 = vld [vmem:[#allocation7 + $0x1d8] sm:$0xff]  ;;  %p1793_p10 = scmp.ne.s32.totalorder %s1521_s1, %s1792_s21  ;;  %p1798_p12 = scmp.lt.s32.totalorder %s1792_s21, %s1792_s21 }
  0x20   :  { %118 = vmatprep.subr.mxu0 %v1851_v3  ;;  %v1871_v10 = vld [vmem:[#allocation7 + $0x168] sm:$0xff]  ;;  %v1877_v12 = vld [vmem:[#allocation7 + $0x160] sm:$0xff]  ;;  %v1882_v14 = vld [vmem:[#allocation7 + $0x1d0] sm:$0xff]  ;;  %189 = vmatprep.subr.mxu1 %v1880_v13 }
  0x21   :  { %119 = vmatpush1.msra.mxu0 %v1854_v4  ;;  %v1885_v15 = vld [vmem:[#allocation7 + $0x148] sm:$0xff]  ;;  %v1888_v16 = vld [vmem:[#allocation7 + $0x1b8] sm:$0xff]  ;;  %v1891_v17 = vld [vmem:[#allocation7 + $0x140] sm:$0xff]  ;;  %190 = vmatpush1.msra.mxu1 %v1882_v14  ;;  %p1799_p13 = por %p1798_p12, %p1797_p11 }
  0x22   :  { %120 = vmatprep.subr.mxu0 %v1857_v5  ;;  %v1894_v18 = vld [vmem:[#allocation7 + $0x1b0] sm:$0xff]  ;;  %v1896_v19 = vld [vmem:[#allocation7 + $0x198] sm:$0xff]  ;;  %v1899_v20 = vld [vmem:[#allocation7 + $0x128] sm:$0xff]  ;;  %191 = vmatprep.subr.mxu1 %v1888_v16 }
  0x23   :  { %121 = vmatpush1.msra.mxu0 %v1860_v6  ;;  %v1902_v21 = vld [vmem:[#allocation7 + $0x190] sm:$0xff]  ;;  %v1905_v22 = vld [vmem:[#allocation7 + $0x120] sm:$0xff]  ;;  %192 = vmatpush1.msra.mxu1 %v1894_v18  ;;  %v1908_v23 = vld [vmem:[#allocation7 + $0x178] sm:$0xff]  ;;  %p1800_p0 = pnand %p1799_p13, %p1793_p10 }
  0x24   :  { %122 = vmatprep.subr.mxu0 %v1863_v7  ;;  %v1911_v24 = vld [vmem:[#allocation7 + $0x108] sm:$0xff]  ;;  %193 = vmatprep.subr.mxu1 %v1896_v19  ;;  %v1914_v25 = vld [vmem:[#allocation7 + $0x170] sm:$0xff]  ;;  %v1917_v26 = vld [vmem:[#allocation7 + $0x100] sm:$0xff] }
  0x25   :  { %123 = vmatpush1.msra.mxu0 %v1866_v8  ;;  %194 = vmatpush1.msra.mxu1 %v1902_v21  ;;  %v1920_v27 = vld [vmem:[#allocation7 + $0x158] sm:$0xff]  ;;  %v1923_v28 = vld [vmem:[#allocation7 + $0xe8] sm:$0xff]  ;;  %v1926_v29 = vld [vmem:[#allocation7 + $0x150] sm:$0xff] }
  0x26   :  { %124 = vmatprep.subr.mxu0 %v1871_v10  ;;  %195 = vmatprep.subr.mxu1 %v1908_v23  ;;  %v1929_v30 = vld [vmem:[#allocation7 + $0xe0] sm:$0xff]  ;;  %v1932_v31 = vld [vmem:[#allocation7 + $0x138] sm:$0xff]  ;;  %v1935_v32 = vld [vmem:[#allocation7 + $0xc8] sm:$0xff] }
  0x27   :  { %125 = vmatpush1.msra.mxu0 %v1877_v12  ;;  %196 = vmatpush1.msra.mxu1 %v1914_v25  ;;  %v1938_v33 = vld [vmem:[#allocation7 + $0x130] sm:$0xff]  ;;  %v1941_v34 = vld [vmem:[#allocation7 + $0xc0] sm:$0xff]  ;;  %v1944_v35 = vld [vmem:[#allocation7 + $0x118] sm:$0xff] }
  0x28   :  { %126 = vmatprep.subr.mxu0 %v1885_v15  ;;  %197 = vmatprep.subr.mxu1 %v1920_v27  ;;  %v1947_v36 = vld [vmem:[#allocation7 + $0xa8] sm:$0xff]  ;;  %v1950_v37 = vld [vmem:[#allocation7 + $0x110] sm:$0xff]  ;;  %v1953_v38 = vld [vmem:[#allocation7 + $0xa0] sm:$0xff] }
  0x29   :  { %127 = vmatpush1.msra.mxu0 %v1891_v17  ;;  %198 = vmatpush1.msra.mxu1 %v1926_v29  ;;  %v1956_v39 = vld [vmem:[#allocation7 + $0xf8] sm:$0xff]  ;;  %v1959_v40 = vld [vmem:[#allocation7 + $0x88] sm:$0xff]  ;;  %v1962_v41 = vld [vmem:[#allocation7 + $0xf0] sm:$0xff] }
  0x2a   :  { %128 = vmatprep.subr.mxu0 %v1899_v20  ;;  %199 = vmatprep.subr.mxu1 %v1932_v31  ;;  %v1965_v42 = vld [vmem:[#allocation7 + $0x80] sm:$0xff]  ;;  %v1968_v43 = vld [vmem:[#allocation7 + $0xd8] sm:$0xff]  ;;  %v1971_v44 = vld [vmem:[#allocation7 + $0x68] sm:$0xff] }
  0x2b   :  { %129 = vmatpush1.msra.mxu0 %v1905_v22  ;;  %200 = vmatpush1.msra.mxu1 %v1938_v33  ;;  %2732 = vst [vmem:[#allocation15_spill] sm:$0xff] %v1965_v42  ;;  %2733 = vst [vmem:[#allocation16_spill] sm:$0xff] %v1971_v44  ;;  %v1974_v45 = vld [vmem:[#allocation7 + $0xd0] sm:$0xff]  ;;  %v1977_v46 = vld [vmem:[#allocation7 + $0x60] sm:$0xff] }
  0x2c   :  { %130 = vmatprep.subr.mxu0 %v1911_v24  ;;  %201 = vmatprep.subr.mxu1 %v1944_v35  ;;  %2734 = vst [vmem:[#allocation17_spill] sm:$0xff] %v1977_v46  ;;  %v1980_v47 = vld [vmem:[#allocation7 + $0xb8] sm:$0xff]  ;;  %v1983_v48 = vld [vmem:[#allocation7 + $0x48] sm:$0xff]  ;;  %v1986_v49 = vld [vmem:[#allocation7 + $0xb0] sm:$0xff] }
  0x2d   :  { %131 = vmatpush1.msra.mxu0 %v1917_v26  ;;  %202 = vmatpush1.msra.mxu1 %v1950_v37  ;;  %2735 = vst [vmem:[#allocation18_spill] sm:$0xff] %v1983_v48  ;;  %v1989_v50 = vld [vmem:[#allocation7 + $0x40] sm:$0xff]  ;;  %v1992_v51 = vld [vmem:[#allocation7 + $0x98] sm:$0xff]  ;;  %v1995_v52 = vld [vmem:[#allocation7 + $0x28] sm:$0xff] }
  0x2e   :  { %132 = vmatprep.subr.mxu0 %v1923_v28  ;;  %203 = vmatprep.subr.mxu1 %v1956_v39  ;;  %2736 = vst [vmem:[#allocation19_spill] sm:$0xff] %v1989_v50  ;;  %2737 = vst [vmem:[#allocation20_spill] sm:$0xff] %v1995_v52  ;;  %v1998_v53 = vld [vmem:[#allocation7 + $0x90] sm:$0xff]  ;;  %v2001_v54 = vld [vmem:[#allocation7 + $0x20] sm:$0xff] }
  0x2f   :  { %133 = vmatpush1.msra.mxu0 %v1929_v30  ;;  %204 = vmatpush1.msra.mxu1 %v1962_v41  ;;  %2738 = vst [vmem:[#allocation21_spill] sm:$0xff] %v1998_v53  ;;  %2739 = vst [vmem:[#allocation22_spill] sm:$0xff] %v2001_v54  ;;  %v2004_v55 = vld [vmem:[#allocation7 + $0x78] sm:$0xff]  ;;  %v2007_v56 = vld [vmem:[#allocation7 + $0x8] sm:$0xff] }
  0x30   :  { %134 = vmatprep.subr.mxu0 %v1935_v32  ;;  %205 = vmatprep.subr.mxu1 %v1968_v43  ;;  %2740 = vst [vmem:[#allocation23_spill] sm:$0xff] %v2004_v55  ;;  %2741 = vst [vmem:[#allocation24_spill] sm:$0xff] %v2007_v56  ;;  %v2010_v57 = vld [vmem:[#allocation7 + $0x70] sm:$0xff]  ;;  %v2013_v58 = vld [vmem:[#allocation7] sm:$0xff] }
  0x31   :  { %135 = vmatpush1.msra.mxu0 %v1941_v34  ;;  %206 = vmatpush1.msra.mxu1 %v1974_v45  ;;  %2742 = vst [vmem:[#allocation25_spill] sm:$0xff] %v2010_v57  ;;  %2743 = vst [vmem:[#allocation26_spill] sm:$0xff] %v2013_v58  ;;  %v2016_v59 = vld [vmem:[#allocation7 + $0x58] sm:$0xff]  ;;  %v2020_v60 = vld [vmem:[#allocation7 + $0x50] sm:$0xff] }
  0x32   :  { %136 = vmatprep.subr.mxu0 %v1947_v36  ;;  %207 = vmatprep.subr.mxu1 %v1980_v47  ;;  %2744 = vst [vmem:[#allocation27_spill] sm:$0xff] %v2016_v59  ;;  %2745 = vst [vmem:[#allocation28_spill] sm:$0xff] %v2020_v60  ;;  %v2024_v61 = vld [vmem:[#allocation7 + $0x38] sm:$0xff]  ;;  %v2028_v62 = vld [vmem:[#allocation7 + $0x30] sm:$0xff] }
  0x33   :  { %137 = vmatpush1.msra.mxu0 %v1953_v38  ;;  %208 = vmatpush1.msra.mxu1 %v1986_v49  ;;  %2746 = vst [vmem:[#allocation29_spill] sm:$0xff] %v2024_v61  ;;  %2747 = vst [vmem:[#allocation30_spill] sm:$0xff] %v2028_v62  ;;  %v2032_v63 = vld [vmem:[#allocation7 + $0x18] sm:$0xff] }
  0x34   :  { %138 = vmatprep.subr.mxu0 %v1959_v40  ;;  %209 = vmatprep.subr.mxu1 %v1992_v51  ;;  %2748 = vst [vmem:[#allocation31_spill] sm:$0xff] %v2032_v63 }
  0x35   :  { %139 = vmatpush1.msra.mxu0 %v1965_v42  ;;  %210 = vmatpush1.msra.mxu1 %v1998_v53 }
  0x36   :  { %140 = vmatprep.subr.mxu0 %v1971_v44  ;;  %211 = vmatprep.subr.mxu1 %v2004_v55 }
  0x37   :  { %141 = vmatpush1.msra.mxu0 %v1977_v46  ;;  %212 = vmatpush1.msra.mxu1 %v2010_v57 }
  0x38   :  { %142 = vmatprep.subr.mxu0 %v1983_v48  ;;  %213 = vmatprep.subr.mxu1 %v2016_v59 }
  0x39   :  { %143 = vmatpush1.msra.mxu0 %v1989_v50  ;;  %214 = vmatpush1.msra.mxu1 %v2020_v60 }
  0x3a   :  { %144 = vmatprep.subr.mxu0 %v1995_v52  ;;  %215 = vmatprep.subr.mxu1 %v2024_v61 }
  0x3b   :  { %145 = vmatpush1.msra.mxu0 %v2001_v54  ;;  %v2035_v54 = vld [vmem:[#allocation7 + $0x10] sm:$0xff]  ;;  %216 = vmatpush1.msra.mxu1 %v2028_v62 }
  0x3c   :  { %146 = vmatprep.subr.mxu0 %v2007_v56  ;;  %2749 = vst [vmem:[#allocation32_spill] sm:$0xff] %v2035_v54  ;;  %217 = vmatprep.subr.mxu1 %v2032_v63 }
  0x3d   :  { %147 = vmatpush1.msra.mxu0 %v2013_v58  ;;  %218 = vmatpush1.msra.mxu1 %v2035_v54 }
  0x3e   :  { %181 = vmatmul.mubr.f32.vlgmr.msra.gmra.mxu0 %v2663_v0  ;;  %291 = vmatprep.subr.mxu0 %v1847_v1 }
  0x3f   :  { %292 = vmatpush1.msra.mxu0 %v1849_v2  ;;  %252 = vmatmul.mubr.f32.vlgmr.msra.gmra.mxu1 %v2663_v0  ;;  %v2750_v0 = vld [vmem:[#allocation22_spill] sm:$0xff] }
  0x40   :  { %293 = vmatprep.subr.mxu0 %v1851_v3  ;;  %362 = vmatprep.subr.mxu1 %v1868_v9 }
  0x41   :  { %294 = vmatpush1.msra.mxu0 %v1854_v4  ;;  %363 = vmatpush1.msra.mxu1 %v1874_v11 }
  0x42   :  { %295 = vmatprep.subr.mxu0 %v1857_v5  ;;  %364 = vmatprep.subr.mxu1 %v1880_v13 }
  0x43   :  { %296 = vmatpush1.msra.mxu0 %v1860_v6  ;;  %365 = vmatpush1.msra.mxu1 %v1882_v14 }
  0x44   :  { %297 = vmatprep.subr.mxu0 %v1863_v7  ;;  %366 = vmatprep.subr.mxu1 %v1888_v16 }
  0x45   :  { %298 = vmatpush1.msra.mxu0 %v1866_v8  ;;  %367 = vmatpush1.msra.mxu1 %v1894_v18 }
  0x46   :  { %299 = vmatprep.subr.mxu0 %v1871_v10  ;;  %368 = vmatprep.subr.mxu1 %v1896_v19 }
  0x47   :  { %300 = vmatpush1.msra.mxu0 %v1877_v12  ;;  %369 = vmatpush1.msra.mxu1 %v1902_v21 }
  0x48   :  { %301 = vmatprep.subr.mxu0 %v1885_v15  ;;  %370 = vmatprep.subr.mxu1 %v1908_v23 }
  0x49   :  { %302 = vmatpush1.msra.mxu0 %v1891_v17  ;;  %371 = vmatpush1.msra.mxu1 %v1914_v25 }
  0x4a   :  { %303 = vmatprep.subr.mxu0 %v1899_v20  ;;  %372 = vmatprep.subr.mxu1 %v1920_v27 }
  0x4b   :  { %304 = vmatpush1.msra.mxu0 %v1905_v22  ;;  %373 = vmatpush1.msra.mxu1 %v1926_v29 }
  0x4c   :  { %305 = vmatprep.subr.mxu0 %v1911_v24  ;;  %374 = vmatprep.subr.mxu1 %v1932_v31 }
  0x4d   :  { %306 = vmatpush1.msra.mxu0 %v1917_v26  ;;  %375 = vmatpush1.msra.mxu1 %v1938_v33 }
  0x4e   :  { %307 = vmatprep.subr.mxu0 %v1923_v28  ;;  %376 = vmatprep.subr.mxu1 %v1944_v35 }
  0x4f   :  { %308 = vmatpush1.msra.mxu0 %v1929_v30  ;;  %377 = vmatpush1.msra.mxu1 %v1950_v37 }
  0x50   :  { %309 = vmatprep.subr.mxu0 %v1935_v32  ;;  %378 = vmatprep.subr.mxu1 %v1956_v39 }
  0x51   :  { %310 = vmatpush1.msra.mxu0 %v1941_v34  ;;  %379 = vmatpush1.msra.mxu1 %v1962_v41 }
  0x52   :  { %311 = vmatprep.subr.mxu0 %v1947_v36  ;;  %380 = vmatprep.subr.mxu1 %v1968_v43 }
  0x53   :  { %312 = vmatpush1.msra.mxu0 %v1953_v38  ;;  %381 = vmatpush1.msra.mxu1 %v1974_v45 }
  0x54   :  { %313 = vmatprep.subr.mxu0 %v1959_v40  ;;  %382 = vmatprep.subr.mxu1 %v1980_v47 }
  0x55   :  { %314 = vmatpush1.msra.mxu0 %v1965_v42  ;;  %383 = vmatpush1.msra.mxu1 %v1986_v49 }
  0x56   :  { %315 = vmatprep.subr.mxu0 %v1971_v44  ;;  %384 = vmatprep.subr.mxu1 %v1992_v51 }
  0x57   :  { %316 = vmatpush1.msra.mxu0 %v1977_v46  ;;  %385 = vmatpush1.msra.mxu1 %v1998_v53 }
  0x58   :  { %317 = vmatprep.subr.mxu0 %v1983_v48  ;;  %386 = vmatprep.subr.mxu1 %v2004_v55  ;;  %v2751_v48 = vmov 0.0  }
  0x59   :  { %318 = vmatpush1.msra.mxu0 %v1989_v50  ;;  %387 = vmatpush1.msra.mxu1 %v2010_v57 }
  0x5a   :  { %319 = vmatprep.subr.mxu0 %v1995_v52  ;;  %388 = vmatprep.subr.mxu1 %v2016_v59  ;;  %v49_v52 = vld [vmem:[#allocation4 + $0x8] sm:$0xff] }
  0x5b   :  { %320 = vmatpush1.msra.mxu0 %v2750_v0  ;;  %389 = vmatpush1.msra.mxu1 %v2020_v60  ;;  %v48_v0 = vld [vmem:[#allocation4] sm:$0xff] }
  0x5c   :  { %321 = vmatprep.subr.mxu0 %v2007_v56  ;;  %390 = vmatprep.subr.mxu1 %v2024_v61 }
  0x5d   :  { %322 = vmatpush1.msra.mxu0 %v2013_v58  ;;  %391 = vmatpush1.msra.mxu1 %v2028_v62 }
  0x5e   :  { %355 = vmatprep.mubr.f32.mxu0 %v2751_v48  ;;  %392 = vmatprep.subr.mxu1 %v2032_v63  ;;  %v51_v63 = vld [vmem:[#allocation4 + $0x18] sm:$0xff] }
  0x5f   :  { %426 = vmatprep.mubr.f32.mxu1 %v2751_v48  ;;  %393 = vmatpush1.msra.mxu1 %v2035_v54  ;;  %v50_v48 = vld [vmem:[#allocation4 + $0x10] sm:$0xff] }
  0x60   :  { %466 = vmatprep.subr.mxu0 %v1847_v1  ;;  %537 = vmatprep.subr.mxu1 %v1868_v9 }
  0xfe   :  { %v182_v56 = vpop.f32.mrf.mxu0 }
  0xff   :  { %v258_v61 = vadd.f32 %v182_v56, %v48_v0  ;;  %v253_v59 = vpop.f32.mrf.mxu1 }
 0x100   :  { %v184_v60 = vpop.f32.mrf.mxu0  ;;  %v260_v54 = vadd.f32 %v253_v59, %v50_v48  ;;  %v2757_v59 = vld [vmem:[#allocation18_spill] sm:$0xff] }
 0x101   :  { %v1530_v58 = vmul.f32 -1.442695, %v258_v61  ;;  %v259_v50 = vadd.f32 %v184_v60, %v49_v52  ;;  %v255_v57 = vpop.f32.mrf.mxu1 }
 0x102   :  { %v261_v46 = vadd.f32 %v255_v57, %v51_v63  ;;  %v2756_v57 = vld [vmem:[#allocation25_spill] sm:$0xff]  ;;  %v2758_v63 = vld [vmem:[#allocation27_spill] sm:$0xff] }
 0x103   :  { %1560 = vpow2.f32 %v1530_v58  ;;  %v1531_v62 = vmul.f32 -1.442695, %v259_v50 }
 0x104   :  { %v1532_v55 = vmul.f32 -1.442695, %v261_v46 }
 0x105   :  { %1562 = vpow2.f32 %v1531_v62 }
 0x106   :  { %1564 = vtanh.f32 %v260_v54  ;;  %v2754_v54 = vld [vmem:[#allocation23_spill] sm:$0xff] }
 0x107   :  { %1566 = vpow2.f32 %v1532_v55  ;;  %v2755_v55 = vld [vmem:[#allocation17_spill] sm:$0xff] }
 0x110   :  { %v1561_v1 = vpop.eup %1560 }
 0x111   :  { %v265_v44 = vadd.f32 1.0, %v1561_v1 }
 0x112   :  { %v1563_v9 = vpop.eup %1562 }
 0x113   :  { %1568 = vrcp.f32 %v265_v44  ;;  %v271_v0 = vadd.f32 1.0, %v1563_v9  ;;  %v1565_v56 = vpop.eup %1564  ;;  %v2752_v9 = vld [vmem:[#allocation21_spill] sm:$0xff]  ;;  %v2753_v44 = vld [vmem:[#allocation16_spill] sm:$0xff] }
 0x114   :  { %v1567_v52 = vpop.eup %1566 }
 0x115   :  { %1570 = vrcp.f32 %v271_v0  ;;  %v278_v60 = vadd.f32 1.0, %v1567_v52  ;;  %v2759_v0 = vld [vmem:[#allocation19_spill] sm:$0xff]  ;;  %v2761_v52 = vld [vmem:[#allocation20_spill] sm:$0xff] }
 0x117   :  { %1572 = vrcp.f32 %v278_v60  ;;  %v2764_v60 = vld [vmem:[#allocation30_spill] sm:$0xff] }
 0x120   :  { %v1569_v58 = vpop.eup %1568 }
 0x121   :  { %v282_v62 = vmul.f32 %v1569_v58, %v1565_v56  ;;  %v2760_v56 = vld [vmem:[#allocation28_spill] sm:$0xff]  ;;  %v2762_v58 = vld [vmem:[#allocation29_spill] sm:$0xff] }
 0x122   :  { %v1571_v50 = vpop.eup %1570 }
 0x123   :  { %v281_v61 = vmul.f32 0.0, %v1571_v50  ;;  %v2763_v50 = vld [vmem:[#allocation22_spill] sm:$0xff] }
 0x124   :  { %v1573_v46 = vpop.eup %1572 }
 0x125   :  { %v2109_v53 = vadd.f32 %v282_v62, %v281_v61  ;;  %v2765_v61 = vld [vmem:[#allocation24_spill] sm:$0xff]  ;;  %v2766_v62 = vld [vmem:[#allocation31_spill] sm:$0xff] }
 0x127   :  { %1574 = vtanh.f32 %v2109_v53 }
 0x134   :  { %v1575_v1 = vpop.eup %1574 }
 0x135   :  { %v285_v48 = vmul.f32 %v1575_v1, %v1573_v46  ;;  %v2767_v46 = vld [vmem:[#allocation26_spill] sm:$0xff]  ;;  %v2768_v1 = vmov 0.0  }
 0x137   :  { %356 = vmatmul.mubr.f32.vlgmr.msra.gmra.mxu0 %v285_v48  ;;  %427 = vmatmul.mubr.f32.vlgmr.msra.gmra.mxu1 %v285_v48  ;;  %v2769_v48 = vld [vmem:[#allocation32_spill] sm:$0xff] }
 0x138   :  { %467 = vmatpush1.msra.mxu0 %v1849_v2  ;;  %538 = vmatpush1.msra.mxu1 %v1874_v11 }
 0x139   :  { %468 = vmatprep.subr.mxu0 %v1851_v3  ;;  %539 = vmatprep.subr.mxu1 %v1880_v13 }
 0x13a   :  { %469 = vmatpush1.msra.mxu0 %v1854_v4  ;;  %540 = vmatpush1.msra.mxu1 %v1882_v14 }
 0x13b   :  { %470 = vmatprep.subr.mxu0 %v1857_v5  ;;  %541 = vmatprep.subr.mxu1 %v1888_v16 }
 0x13c   :  { %471 = vmatpush1.msra.mxu0 %v1860_v6  ;;  %542 = vmatpush1.msra.mxu1 %v1894_v18 }
 0x13d   :  { %472 = vmatprep.subr.mxu0 %v1863_v7  ;;  %543 = vmatprep.subr.mxu1 %v1896_v19 }
 0x13e   :  { %473 = vmatpush1.msra.mxu0 %v1866_v8  ;;  %544 = vmatpush1.msra.mxu1 %v1902_v21 }
 0x13f   :  { %474 = vmatprep.subr.mxu0 %v1871_v10  ;;  %545 = vmatprep.subr.mxu1 %v1908_v23 }
 0x140   :  { %475 = vmatpush1.msra.mxu0 %v1877_v12  ;;  %546 = vmatpush1.msra.mxu1 %v1914_v25 }
 0x141   :  { %476 = vmatprep.subr.mxu0 %v1885_v15  ;;  %547 = vmatprep.subr.mxu1 %v1920_v27 }
 0x142   :  { %477 = vmatpush1.msra.mxu0 %v1891_v17  ;;  %548 = vmatpush1.msra.mxu1 %v1926_v29 }
 0x143   :  { %478 = vmatprep.subr.mxu0 %v1899_v20  ;;  %549 = vmatprep.subr.mxu1 %v1932_v31 }
 0x144   :  { %479 = vmatpush1.msra.mxu0 %v1905_v22  ;;  %550 = vmatpush1.msra.mxu1 %v1938_v33 }
 0x145   :  { %480 = vmatprep.subr.mxu0 %v1911_v24  ;;  %551 = vmatprep.subr.mxu1 %v1944_v35 }
 0x146   :  { %481 = vmatpush1.msra.mxu0 %v1917_v26  ;;  %552 = vmatpush1.msra.mxu1 %v1950_v37 }
 0x147   :  { %482 = vmatprep.subr.mxu0 %v1923_v28  ;;  %553 = vmatprep.subr.mxu1 %v1956_v39 }
 0x148   :  { %483 = vmatpush1.msra.mxu0 %v1929_v30  ;;  %554 = vmatpush1.msra.mxu1 %v1962_v41 }
 0x149   :  { %484 = vmatprep.subr.mxu0 %v1935_v32  ;;  %555 = vmatprep.subr.mxu1 %v1968_v43 }
 0x14a   :  { %485 = vmatpush1.msra.mxu0 %v1941_v34  ;;  %556 = vmatpush1.msra.mxu1 %v1974_v45 }
 0x14b   :  { %486 = vmatprep.subr.mxu0 %v1947_v36  ;;  %557 = vmatprep.subr.mxu1 %v1980_v47 }
 0x14c   :  { %487 = vmatpush1.msra.mxu0 %v1953_v38  ;;  %558 = vmatpush1.msra.mxu1 %v1986_v49 }
 0x14d   :  { %488 = vmatprep.subr.mxu0 %v1959_v40  ;;  %559 = vmatprep.subr.mxu1 %v1992_v51 }
 0x14e   :  { %489 = vmatpush1.msra.mxu0 %v1965_v42  ;;  %560 = vmatpush1.msra.mxu1 %v2752_v9 }
 0x14f   :  { %490 = vmatprep.subr.mxu0 %v2753_v44  ;;  %561 = vmatprep.subr.mxu1 %v2754_v54  ;;  %v289_v54 = vld [vmem:[#allocation4 + $0x30] sm:$0xff] }
 0x150   :  { %491 = vmatpush1.msra.mxu0 %v2755_v55  ;;  %562 = vmatpush1.msra.mxu1 %v2756_v57  ;;  %v290_v57 = vld [vmem:[#allocation4 + $0x38] sm:$0xff] }
 0x151   :  { %492 = vmatprep.subr.mxu0 %v2757_v59  ;;  %563 = vmatprep.subr.mxu1 %v2758_v63 }
 0x152   :  { %493 = vmatpush1.msra.mxu0 %v2759_v0  ;;  %564 = vmatpush1.msra.mxu1 %v2760_v56  ;;  %v2770_v56 = vld [vmem:[#allocation13_spill] sm:$0xff] }
 0x153   :  { %494 = vmatprep.subr.mxu0 %v2761_v52  ;;  %565 = vmatprep.subr.mxu1 %v2762_v58  ;;  %v2771_v52 = vld [vmem:[#allocation14_spill] sm:$0xff]  ;;  %v287_v58 = vld [vmem:[#allocation4 + $0x20] sm:$0xff]  ;;  %v288_v0 = vld [vmem:[#allocation4 + $0x28] sm:$0xff] }
 0x154   :  { %495 = vmatpush1.msra.mxu0 %v2763_v50  ;;  %566 = vmatpush1.msra.mxu1 %v2764_v60 }
 0x155   :  { %496 = vmatprep.subr.mxu0 %v2765_v61  ;;  %567 = vmatprep.subr.mxu1 %v2766_v62 }
 0x156   :  { %497 = vmatpush1.msra.mxu0 %v2767_v46  ;;  %530 = vmatprep.mubr.f32.mxu0 %v2768_v1 }
 0x157   :  { %568 = vmatpush1.msra.mxu1 %v2769_v48  ;;  %601 = vmatprep.mubr.f32.mxu1 %v2768_v1 }
 0x158   :  { %641 = vmatprep.subr.mxu0 %v2770_v56  ;;  %712 = vmatprep.subr.mxu1 %v2771_v52 }
 0x1f7   :  { %v357_v50 = vpop.f32.mrf.mxu0  ;;  %v428_v62 = vpop.f32.mrf.mxu1 }
 0x1f8   :  { %v433_v60 = vadd.f32 %v357_v50, %v287_v58  ;;  %v435_v56 = vadd.f32 %v428_v62, %v289_v54  ;;  %v2777_v62 = vld [vmem:[#allocation25_spill] sm:$0xff] }
 0x1f9   :  { %v359_v63 = vpop.f32.mrf.mxu0  ;;  %v430_v55 = vpop.f32.mrf.mxu1 }
 0x1fa   :  { %v1533_v61 = vmul.f32 -1.442695, %v433_v60  ;;  %v434_v59 = vadd.f32 %v359_v63, %v288_v0  ;;  %v436_v48 = vadd.f32 %v430_v55, %v290_v57 }
 0x1fc   :  { %1576 = vpow2.f32 %v1533_v61  ;;  %v1534_v46 = vmul.f32 -1.442695, %v434_v59  ;;  %v1535_v1 = vmul.f32 -1.442695, %v436_v48  ;;  %v2780_v48 = vld [vmem:[#allocation19_spill] sm:$0xff] }
 0x1fe   :  { %1578 = vpow2.f32 %v1534_v46  ;;  %v2778_v46 = vld [vmem:[#allocation18_spill] sm:$0xff] }
 0x1ff   :  { %1580 = vpow2.f32 %v1535_v1  ;;  %v2779_v1 = vld [vmem:[#allocation27_spill] sm:$0xff] }
 0x209   :  { %v1577_v44 = vpop.eup %1576 }
 0x20a   :  { %v440_v9 = vadd.f32 1.0, %v1577_v44 }
 0x20b   :  { %v1579_v52 = vpop.eup %1578 }
 0x20c   :  { %1582 = vrcp.f32 %v440_v9  ;;  %v446_v42 = vadd.f32 1.0, %v1579_v52  ;;  %v1581_v58 = vpop.eup %1580  ;;  %v2774_v9 = vld [vmem:[#allocation16_spill] sm:$0xff]  ;;  %v2776_v52 = vld [vmem:[#allocation17_spill] sm:$0xff] }
 0x20d   :  { %1584 = vtanh.f32 %v435_v56  ;;  %v453_v59 = vadd.f32 1.0, %v1581_v58  ;;  %v2775_v56 = vld [vmem:[#allocation23_spill] sm:$0xff]  ;;  %v2781_v58 = vld [vmem:[#allocation28_spill] sm:$0xff] }
 0x20e   :  { %1586 = vrcp.f32 %v446_v42  ;;  %v2772_v42 = vld [vmem:[#allocation15_spill] sm:$0xff] }
 0x20f   :  { %1588 = vrcp.f32 %v453_v59  ;;  %v2785_v59 = vld [vmem:[#allocation30_spill] sm:$0xff] }
 0x219   :  { %v1583_v63 = vpop.eup %1582 }
 0x21a   :  { %v1585_v0 = vpop.eup %1584 }
 0x21b   :  { %v1587_v50 = vpop.eup %1586  ;;  %v457_v60 = vmul.f32 %v1585_v0, %v1583_v63  ;;  %v2782_v63 = vld [vmem:[#allocation20_spill] sm:$0xff]  ;;  %v2783_v0 = vld [vmem:[#allocation29_spill] sm:$0xff] }
 0x21c   :  { %v456_v61 = vmul.f32 %v1587_v50, %v2109_v53  ;;  %v1589_v44 = vpop.eup %1588  ;;  %v2773_v53 = vld [vmem:[#allocation21_spill] sm:$0xff]  ;;  %v2784_v50 = vld [vmem:[#allocation22_spill] sm:$0xff] }
 0x21e   :  { %v2179_v55 = vadd.f32 %v457_v60, %v456_v61  ;;  %v2786_v60 = vld [vmem:[#allocation24_spill] sm:$0xff]  ;;  %v2787_v61 = vld [vmem:[#allocation31_spill] sm:$0xff] }
 0x220   :  { %1590 = vtanh.f32 %v2179_v55 }
 0x22d   :  { %v1591_v54 = vpop.eup %1590 }
 0x22e   :  { %v460_v57 = vmul.f32 %v1591_v54, %v1589_v44  ;;  %v2788_v44 = vld [vmem:[#allocation26_spill] sm:$0xff]  ;;  %v2789_v54 = vmov 0.0  }
 0x230   :  { %531 = vmatmul.mubr.f32.vlgmr.msra.gmra.mxu0 %v460_v57  ;;  %602 = vmatmul.mubr.f32.vlgmr.msra.gmra.mxu1 %v460_v57  ;;  %v2790_v57 = vld [vmem:[#allocation32_spill] sm:$0xff] }
 0x231   :  { %642 = vmatpush1.msra.mxu0 %v1849_v2  ;;  %713 = vmatpush1.msra.mxu1 %v1874_v11 }
 0x232   :  { %643 = vmatprep.subr.mxu0 %v1851_v3  ;;  %714 = vmatprep.subr.mxu1 %v1880_v13 }
 0x233   :  { %644 = vmatpush1.msra.mxu0 %v1854_v4  ;;  %715 = vmatpush1.msra.mxu1 %v1882_v14 }
 0x234   :  { %645 = vmatprep.subr.mxu0 %v1857_v5  ;;  %716 = vmatprep.subr.mxu1 %v1888_v16 }
 0x235   :  { %646 = vmatpush1.msra.mxu0 %v1860_v6  ;;  %717 = vmatpush1.msra.mxu1 %v1894_v18 }
 0x236   :  { %647 = vmatprep.subr.mxu0 %v1863_v7  ;;  %718 = vmatprep.subr.mxu1 %v1896_v19 }
 0x237   :  { %648 = vmatpush1.msra.mxu0 %v1866_v8  ;;  %719 = vmatpush1.msra.mxu1 %v1902_v21 }
 0x238   :  { %649 = vmatprep.subr.mxu0 %v1871_v10  ;;  %720 = vmatprep.subr.mxu1 %v1908_v23 }
 0x239   :  { %650 = vmatpush1.msra.mxu0 %v1877_v12  ;;  %721 = vmatpush1.msra.mxu1 %v1914_v25 }
 0x23a   :  { %651 = vmatprep.subr.mxu0 %v1885_v15  ;;  %722 = vmatprep.subr.mxu1 %v1920_v27 }
 0x23b   :  { %652 = vmatpush1.msra.mxu0 %v1891_v17  ;;  %723 = vmatpush1.msra.mxu1 %v1926_v29 }
 0x23c   :  { %653 = vmatprep.subr.mxu0 %v1899_v20  ;;  %724 = vmatprep.subr.mxu1 %v1932_v31 }
 0x23d   :  { %654 = vmatpush1.msra.mxu0 %v1905_v22  ;;  %725 = vmatpush1.msra.mxu1 %v1938_v33 }
 0x23e   :  { %655 = vmatprep.subr.mxu0 %v1911_v24  ;;  %726 = vmatprep.subr.mxu1 %v1944_v35 }
 0x23f   :  { %656 = vmatpush1.msra.mxu0 %v1917_v26  ;;  %727 = vmatpush1.msra.mxu1 %v1950_v37 }
 0x240   :  { %657 = vmatprep.subr.mxu0 %v1923_v28  ;;  %728 = vmatprep.subr.mxu1 %v1956_v39 }
 0x241   :  { %658 = vmatpush1.msra.mxu0 %v1929_v30  ;;  %729 = vmatpush1.msra.mxu1 %v1962_v41 }
 0x242   :  { %659 = vmatprep.subr.mxu0 %v1935_v32  ;;  %730 = vmatprep.subr.mxu1 %v1968_v43 }
 0x243   :  { %660 = vmatpush1.msra.mxu0 %v1941_v34  ;;  %731 = vmatpush1.msra.mxu1 %v1974_v45 }
 0x244   :  { %661 = vmatprep.subr.mxu0 %v1947_v36  ;;  %732 = vmatprep.subr.mxu1 %v1980_v47 }
 0x245   :  { %662 = vmatpush1.msra.mxu0 %v1953_v38  ;;  %733 = vmatpush1.msra.mxu1 %v1986_v49 }
 0x246   :  { %663 = vmatprep.subr.mxu0 %v1959_v40  ;;  %734 = vmatprep.subr.mxu1 %v1992_v51 }
 0x247   :  { %664 = vmatpush1.msra.mxu0 %v2772_v42  ;;  %735 = vmatpush1.msra.mxu1 %v2773_v53 }
 0x248   :  { %665 = vmatprep.subr.mxu0 %v2774_v9  ;;  %736 = vmatprep.subr.mxu1 %v2775_v56  ;;  %v464_v56 = vld [vmem:[#allocation4 + $0x50] sm:$0xff] }
 0x249   :  { %666 = vmatpush1.msra.mxu0 %v2776_v52  ;;  %737 = vmatpush1.msra.mxu1 %v2777_v62  ;;  %v465_v62 = vld [vmem:[#allocation4 + $0x58] sm:$0xff] }
 0x24a   :  { %667 = vmatprep.subr.mxu0 %v2778_v46  ;;  %738 = vmatprep.subr.mxu1 %v2779_v1 }
 0x24b   :  { %668 = vmatpush1.msra.mxu0 %v2780_v48  ;;  %739 = vmatpush1.msra.mxu1 %v2781_v58  ;;  %v2791_v58 = vld [vmem:[#allocation13_spill] sm:$0xff] }
 0x24c   :  { %669 = vmatprep.subr.mxu0 %v2782_v63  ;;  %740 = vmatprep.subr.mxu1 %v2783_v0  ;;  %v2792_v63 = vld [vmem:[#allocation14_spill] sm:$0xff]  ;;  %v462_v0 = vld [vmem:[#allocation4 + $0x40] sm:$0xff]  ;;  %v463_v48 = vld [vmem:[#allocation4 + $0x48] sm:$0xff] }
 0x24d   :  { %670 = vmatpush1.msra.mxu0 %v2784_v50  ;;  %741 = vmatpush1.msra.mxu1 %v2785_v59 }
 0x24e   :  { %671 = vmatprep.subr.mxu0 %v2786_v60  ;;  %742 = vmatprep.subr.mxu1 %v2787_v61 }
 0x24f   :  { %672 = vmatpush1.msra.mxu0 %v2788_v44  ;;  %705 = vmatprep.mubr.f32.mxu0 %v2789_v54 }
 0x250   :  { %743 = vmatpush1.msra.mxu1 %v2790_v57  ;;  %776 = vmatprep.mubr.f32.mxu1 %v2789_v54 }
 0x251   :  { %816 = vmatprep.subr.mxu0 %v2791_v58  ;;  %887 = vmatprep.subr.mxu1 %v2792_v63 }
 0x2f0   :  { %v532_v50 = vpop.f32.mrf.mxu0  ;;  %v603_v61 = vpop.f32.mrf.mxu1 }
 0x2f1   :  { %v608_v59 = vadd.f32 %v532_v50, %v462_v0  ;;  %v610_v58 = vadd.f32 %v603_v61, %v464_v56 }
 0x2f2   :  { %v534_v1 = vpop.f32.mrf.mxu0  ;;  %v605_v52 = vpop.f32.mrf.mxu1 }
 0x2f3   :  { %v1536_v60 = vmul.f32 -1.442695, %v608_v59  ;;  %v609_v46 = vadd.f32 %v534_v1, %v463_v48  ;;  %v611_v57 = vadd.f32 %v605_v52, %v465_v62 }
 0x2f5   :  { %1592 = vpow2.f32 %v1536_v60  ;;  %v1537_v44 = vmul.f32 -1.442695, %v609_v46  ;;  %v1538_v54 = vmul.f32 -1.442695, %v611_v57 }
 0x2f7   :  { %1594 = vpow2.f32 %v1537_v44 }
 0x2f8   :  { %1596 = vpow2.f32 %v1538_v54 }
 0x302   :  { %v1593_v9 = vpop.eup %1592 }
 0x303   :  { %v615_v53 = vadd.f32 1.0, %v1593_v9 }
 0x304   :  { %v1595_v63 = vpop.eup %1594 }
 0x305   :  { %1598 = vrcp.f32 %v615_v53  ;;  %v621_v42 = vadd.f32 1.0, %v1595_v63  ;;  %v1597_v0 = vpop.eup %1596 }
 0x306   :  { %1600 = vtanh.f32 %v610_v58  ;;  %v628_v46 = vadd.f32 1.0, %v1597_v0 }
 0x307   :  { %1602 = vrcp.f32 %v621_v42 }
 0x308   :  { %1604 = vrcp.f32 %v628_v46  ;;  %v2330_v46 = vld [vmem:[#allocation7 + $0x1c8] sm:$0xff] }
 0x312   :  { %v1599_v1 = vpop.eup %1598 }
 0x313   :  { %v1601_v48 = vpop.eup %1600 }
 0x314   :  { %v1603_v50 = vpop.eup %1602  ;;  %v632_v59 = vmul.f32 %v1601_v48, %v1599_v1  ;;  %v2324_v48 = vld [vmem:[#allocation7 + $0x1e0] sm:$0xff] }
 0x315   :  { %v631_v60 = vmul.f32 %v1603_v50, %v2179_v55  ;;  %v1605_v9 = vpop.eup %1604  ;;  %v2327_v50 = vld [vmem:[#allocation7 + $0x1f0] sm:$0xff] }
 0x317   :  { %v2249_v52 = vadd.f32 %v632_v59, %v631_v60  ;;  %v2333_v59 = vld [vmem:[#allocation7 + $0x1d8] sm:$0xff]  ;;  %v2336_v60 = vld [vmem:[#allocation7 + $0x1c0] sm:$0xff] }
 0x319   :  { %1606 = vtanh.f32 %v2249_v52 }
 0x326   :  { %v1607_v56 = vpop.eup %1606 }
 0x327   :  { %v635_v62 = vmul.f32 %v1607_v56, %v1605_v9  ;;  %v2342_v9 = vld [vmem:[#allocation7 + $0x1a8] sm:$0xff]  ;;  %v2345_v56 = vld [vmem:[#allocation7 + $0x1b8] sm:$0xff] }
 0x329   :  { %706 = vmatmul.mubr.f32.vlgmr.msra.gmra.mxu0 %v635_v62  ;;  %777 = vmatmul.mubr.f32.vlgmr.msra.gmra.mxu1 %v635_v62  ;;  %v2348_v62 = vld [vmem:[#allocation7 + $0x1a0] sm:$0xff] }
 0x32a   :  { %817 = vmatpush1.msra.mxu0 %v1849_v2  ;;  %888 = vmatpush1.msra.mxu1 %v1874_v11  ;;  %v2793_v2 = vld [vmem:[#allocation15_spill] sm:$0xff] }
 0x32b   :  { %818 = vmatprep.subr.mxu0 %v1851_v3  ;;  %889 = vmatprep.subr.mxu1 %v1880_v13  ;;  %v2794_v3 = vld [vmem:[#allocation21_spill] sm:$0xff]  ;;  %v2801_v11 = vld [vmem:[#allocation19_spill] sm:$0xff]  ;;  %v2803_v13 = vld [vmem:[#allocation20_spill] sm:$0xff] }
 0x32c   :  { %819 = vmatpush1.msra.mxu0 %v1854_v4  ;;  %890 = vmatpush1.msra.mxu1 %v1882_v14  ;;  %v2795_v4 = vld [vmem:[#allocation16_spill] sm:$0xff]  ;;  %v2804_v14 = vld [vmem:[#allocation29_spill] sm:$0xff] }
 0x32d   :  { %820 = vmatprep.subr.mxu0 %v1857_v5  ;;  %891 = vmatprep.subr.mxu1 %v1888_v16  ;;  %v2796_v5 = vld [vmem:[#allocation23_spill] sm:$0xff]  ;;  %v2806_v16 = vld [vmem:[#allocation30_spill] sm:$0xff] }
 0x32e   :  { %821 = vmatpush1.msra.mxu0 %v1860_v6  ;;  %892 = vmatpush1.msra.mxu1 %v1894_v18  ;;  %v2797_v6 = vld [vmem:[#allocation17_spill] sm:$0xff]  ;;  %v2808_v18 = vld [vmem:[#allocation31_spill] sm:$0xff] }
 0x32f   :  { %822 = vmatprep.subr.mxu0 %v1863_v7  ;;  %893 = vmatprep.subr.mxu1 %v1896_v19  ;;  %v2798_v7 = vld [vmem:[#allocation25_spill] sm:$0xff]  ;;  %v2809_v19 = vld [vmem:[#allocation26_spill] sm:$0xff] }
 0x330   :  { %823 = vmatpush1.msra.mxu0 %v1866_v8  ;;  %894 = vmatpush1.msra.mxu1 %v1902_v21  ;;  %v2799_v8 = vld [vmem:[#allocation18_spill] sm:$0xff]  ;;  %v2811_v21 = vld [vmem:[#allocation32_spill] sm:$0xff] }
 0x331   :  { %824 = vmatprep.subr.mxu0 %v1871_v10  ;;  %895 = vmatprep.subr.mxu1 %v1908_v23  ;;  %v2800_v10 = vld [vmem:[#allocation27_spill] sm:$0xff]  ;;  %v2813_v23 = vld [vmem:[#allocation14_spill] sm:$0xff] }
 0x332   :  { %825 = vmatpush1.msra.mxu0 %v1877_v12  ;;  %896 = vmatpush1.msra.mxu1 %v1914_v25  ;;  %v2802_v12 = vld [vmem:[#allocation28_spill] sm:$0xff] }
 0x333   :  { %826 = vmatprep.subr.mxu0 %v1885_v15  ;;  %897 = vmatprep.subr.mxu1 %v1920_v27  ;;  %v2805_v15 = vld [vmem:[#allocation22_spill] sm:$0xff] }
 0x334   :  { %827 = vmatpush1.msra.mxu0 %v1891_v17  ;;  %898 = vmatpush1.msra.mxu1 %v1926_v29  ;;  %v2807_v17 = vld [vmem:[#allocation24_spill] sm:$0xff] }
 0x335   :  { %828 = vmatprep.subr.mxu0 %v1899_v20  ;;  %899 = vmatprep.subr.mxu1 %v1932_v31  ;;  %v2810_v20 = vmov 0.0  }
 0x336   :  { %829 = vmatpush1.msra.mxu0 %v1905_v22  ;;  %900 = vmatpush1.msra.mxu1 %v1938_v33  ;;  %v2316_v22 = vld [vmem:[#allocation7 + $0x1e8] sm:$0xff]  ;;  %v640_v33 = vld [vmem:[#allocation4 + $0x78] sm:$0xff] }
 0x337   :  { %830 = vmatprep.subr.mxu0 %v1911_v24  ;;  %901 = vmatprep.subr.mxu1 %v1944_v35  ;;  %2812 = vst [vmem:[#allocation13_spill] sm:$0xff] %v2316_v22  ;;  %v637_v24 = vld [vmem:[#allocation4 + $0x60] sm:$0xff] }
 0x338   :  { %831 = vmatpush1.msra.mxu0 %v1917_v26  ;;  %902 = vmatpush1.msra.mxu1 %v1950_v37  ;;  %v638_v26 = vld [vmem:[#allocation4 + $0x68] sm:$0xff] }
 0x339   :  { %832 = vmatprep.subr.mxu0 %v1923_v28  ;;  %903 = vmatprep.subr.mxu1 %v1956_v39 }
 0x33a   :  { %833 = vmatpush1.msra.mxu0 %v1929_v30  ;;  %904 = vmatpush1.msra.mxu1 %v1962_v41 }
 0x33b   :  { %834 = vmatprep.subr.mxu0 %v1935_v32  ;;  %905 = vmatprep.subr.mxu1 %v1968_v43 }
 0x33c   :  { %835 = vmatpush1.msra.mxu0 %v1941_v34  ;;  %906 = vmatpush1.msra.mxu1 %v1974_v45 }
 0x33d   :  { %836 = vmatprep.subr.mxu0 %v1947_v36  ;;  %907 = vmatprep.subr.mxu1 %v1980_v47  ;;  %v639_v36 = vld [vmem:[#allocation4 + $0x70] sm:$0xff] }
 0x33e   :  { %837 = vmatpush1.msra.mxu0 %v1953_v38  ;;  %908 = vmatpush1.msra.mxu1 %v1986_v49 }
 0x33f   :  { %838 = vmatprep.subr.mxu0 %v1959_v40  ;;  %909 = vmatprep.subr.mxu1 %v1992_v51 }
 0x340   :  { %839 = vmatpush1.msra.mxu0 %v2793_v2  ;;  %910 = vmatpush1.msra.mxu1 %v2794_v3  ;;  %v2351_v2 = vld [vmem:[#allocation7 + $0x1b0] sm:$0xff] }
 0x341   :  { %840 = vmatprep.subr.mxu0 %v2795_v4  ;;  %911 = vmatprep.subr.mxu1 %v2796_v5  ;;  %v2354_v4 = vld [vmem:[#allocation7 + $0x188] sm:$0xff] }
 0x342   :  { %841 = vmatpush1.msra.mxu0 %v2797_v6  ;;  %912 = vmatpush1.msra.mxu1 %v2798_v7  ;;  %v2357_v6 = vld [vmem:[#allocation7 + $0x198] sm:$0xff] }
 0x343   :  { %842 = vmatprep.subr.mxu0 %v2799_v8  ;;  %913 = vmatprep.subr.mxu1 %v2800_v10  ;;  %v2360_v8 = vld [vmem:[#allocation7 + $0x180] sm:$0xff] }
 0x344   :  { %843 = vmatpush1.msra.mxu0 %v2801_v11  ;;  %914 = vmatpush1.msra.mxu1 %v2802_v12  ;;  %v2363_v11 = vld [vmem:[#allocation7 + $0x190] sm:$0xff] }
 0x345   :  { %844 = vmatprep.subr.mxu0 %v2803_v13  ;;  %915 = vmatprep.subr.mxu1 %v2804_v14  ;;  %v2366_v13 = vld [vmem:[#allocation7 + $0x168] sm:$0xff] }
 0x346   :  { %845 = vmatpush1.msra.mxu0 %v2805_v15  ;;  %916 = vmatpush1.msra.mxu1 %v2806_v16 }
 0x347   :  { %846 = vmatprep.subr.mxu0 %v2807_v17  ;;  %917 = vmatprep.subr.mxu1 %v2808_v18 }
 0x348   :  { %847 = vmatpush1.msra.mxu0 %v2809_v19  ;;  %880 = vmatprep.mubr.f32.mxu0 %v2810_v20 }
 0x349   :  { %918 = vmatpush1.msra.mxu1 %v2811_v21  ;;  %951 = vmatprep.mubr.f32.mxu1 %v2810_v20 }
 0x34a   :  { %991 = vmatprep.subr.mxu0 %v2316_v22  ;;  %1062 = vmatprep.subr.mxu1 %v2813_v23  ;;  %v2369_v23 = vld [vmem:[#allocation7 + $0x178] sm:$0xff] }
 0x3e9   :  { %v707_v25 = vpop.f32.mrf.mxu0  ;;  %v778_v31 = vpop.f32.mrf.mxu1 }
 0x3ea   :  { %v783_v27 = vadd.f32 %v707_v25, %v637_v24  ;;  %v785_v39 = vadd.f32 %v778_v31, %v639_v36  ;;  %v2372_v24 = vld [vmem:[#allocation7 + $0x160] sm:$0xff]  ;;  %v2375_v25 = vld [vmem:[#allocation7 + $0x170] sm:$0xff]  ;;  %v2393_v31 = vld [vmem:[#allocation7 + $0x138] sm:$0xff] }
 0x3eb   :  { %v709_v28 = vpop.f32.mrf.mxu0  ;;  %v780_v34 = vpop.f32.mrf.mxu1  ;;  %v2408_v36 = vld [vmem:[#allocation7 + $0x100] sm:$0xff] }
 0x3ec   :  { %v1539_v29 = vmul.f32 -1.442695, %v783_v27  ;;  %v784_v30 = vadd.f32 %v709_v28, %v638_v26  ;;  %v786_v35 = vadd.f32 %v780_v34, %v640_v33  ;;  %v2378_v26 = vld [vmem:[#allocation7 + $0x148] sm:$0xff]  ;;  %v2381_v27 = vld [vmem:[#allocation7 + $0x158] sm:$0xff]  ;;  %v2384_v28 = vld [vmem:[#allocation7 + $0x140] sm:$0xff] }
 0x3ed   :  { %v2399_v33 = vld [vmem:[#allocation7 + $0x130] sm:$0xff]  ;;  %v2402_v34 = vld [vmem:[#allocation7 + $0x108] sm:$0xff] }
 0x3ee   :  { %1608 = vpow2.f32 %v1539_v29  ;;  %v1540_v32 = vmul.f32 -1.442695, %v784_v30  ;;  %v1541_v37 = vmul.f32 -1.442695, %v786_v35  ;;  %v2387_v29 = vld [vmem:[#allocation7 + $0x150] sm:$0xff]  ;;  %v2390_v30 = vld [vmem:[#allocation7 + $0x128] sm:$0xff] }
 0x3ef   :  { %v2405_v35 = vld [vmem:[#allocation7 + $0x118] sm:$0xff] }
 0x3f0   :  { %1610 = vpow2.f32 %v1540_v32  ;;  %v2396_v32 = vld [vmem:[#allocation7 + $0x120] sm:$0xff] }
 0x3f1   :  { %1612 = vpow2.f32 %v1541_v37  ;;  %v2411_v37 = vld [vmem:[#allocation7 + $0x110] sm:$0xff] }
 0x3fb   :  { %v1609_v38 = vpop.eup %1608 }
 0x3fc   :  { %v790_v40 = vadd.f32 1.0, %v1609_v38  ;;  %v2414_v38 = vld [vmem:[#allocation7 + $0xe8] sm:$0xff] }
 0x3fd   :  { %v1611_v41 = vpop.eup %1610 }
 0x3fe   :  { %1614 = vrcp.f32 %v790_v40  ;;  %v796_v43 = vadd.f32 1.0, %v1611_v41  ;;  %v1613_v55 = vpop.eup %1612  ;;  %v2420_v40 = vld [vmem:[#allocation7 + $0xe0] sm:$0xff]  ;;  %v2423_v41 = vld [vmem:[#allocation7 + $0xf0] sm:$0xff] }
 0x3ff   :  { %1616 = vtanh.f32 %v785_v39  ;;  %v803_v61 = vadd.f32 1.0, %v1613_v55  ;;  %v2417_v39 = vld [vmem:[#allocation7 + $0xf8] sm:$0xff] }
 0x400   :  { %1618 = vrcp.f32 %v796_v43  ;;  %v2426_v43 = vld [vmem:[#allocation7 + $0xc8] sm:$0xff]  ;;  %v2429_v55 = vld [vmem:[#allocation7 + $0xd8] sm:$0xff] }
 0x401   :  { %1620 = vrcp.f32 %v803_v61  ;;  %v2444_v61 = vld [vmem:[#allocation7 + $0x88] sm:$0xff] }
 0x40b   :  { %v1615_v42 = vpop.eup %1614 }
 0x40c   :  { %v1617_v53 = vpop.eup %1616 }
 0x40d   :  { %v1619_v63 = vpop.eup %1618  ;;  %v807_v44 = vmul.f32 %v1617_v53, %v1615_v42  ;;  %v2432_v42 = vld [vmem:[#allocation7 + $0xc0] sm:$0xff]  ;;  %v2436_v53 = vld [vmem:[#allocation7 + $0xa8] sm:$0xff] }
 0x40e   :  { %v806_v54 = vmul.f32 %v1619_v63, %v2249_v52  ;;  %v1621_v58 = vpop.eup %1620  ;;  %v2339_v52 = vld [vmem:[#allocation7 + $0x1d0] sm:$0xff]  ;;  %v2440_v63 = vld [vmem:[#allocation7 + $0xa0] sm:$0xff] }
 0x410   :  { %v2321_v57 = vadd.f32 %v807_v44, %v806_v54  ;;  %v2448_v44 = vld [vmem:[#allocation7 + $0x80] sm:$0xff] }
 0x411   :  { %2814 = vst [vmem:[#allocation15_spill] sm:$0xff] %v2448_v44 }
 0x412   :  { %1622 = vtanh.f32 %v2321_v57 }
 0x41f   :  { %v1623_v0 = vpop.eup %1622 }
 0x420   :  { %v810_v1 = vmul.f32 %v1623_v0, %v1621_v58  ;;  %v814_v0 = vld [vmem:[#allocation4 + $0x90] sm:$0xff] }
 0x422   :  { %881 = vmatmul.mubr.f32.vlgmr.msra.gmra.mxu0 %v810_v1  ;;  %952 = vmatmul.mubr.f32.vlgmr.msra.gmra.mxu1 %v810_v1 }
 0x423   :  { %992 = vmatpush1.msra.mxu0 %v2324_v48  ;;  %1063 = vmatpush1.msra.mxu1 %v2327_v50 }
 0x424   :  { %993 = vmatprep.subr.mxu0 %v2330_v46  ;;  %1064 = vmatprep.subr.mxu1 %v2333_v59 }
 0x425   :  { %994 = vmatpush1.msra.mxu0 %v2336_v60  ;;  %1065 = vmatpush1.msra.mxu1 %v2339_v52 }
 0x426   :  { %995 = vmatprep.subr.mxu0 %v2342_v9  ;;  %1066 = vmatprep.subr.mxu1 %v2345_v56 }
 0x427   :  { %996 = vmatpush1.msra.mxu0 %v2348_v62  ;;  %1067 = vmatpush1.msra.mxu1 %v2351_v2 }
 0x428   :  { %997 = vmatprep.subr.mxu0 %v2354_v4  ;;  %1068 = vmatprep.subr.mxu1 %v2357_v6 }
 0x429   :  { %998 = vmatpush1.msra.mxu0 %v2360_v8  ;;  %1069 = vmatpush1.msra.mxu1 %v2363_v11 }
 0x42a   :  { %999 = vmatprep.subr.mxu0 %v2366_v13  ;;  %1070 = vmatprep.subr.mxu1 %v2369_v23 }
 0x42b   :  { %1000 = vmatpush1.msra.mxu0 %v2372_v24  ;;  %1071 = vmatpush1.msra.mxu1 %v2375_v25 }
 0x42c   :  { %1001 = vmatprep.subr.mxu0 %v2378_v26  ;;  %1072 = vmatprep.subr.mxu1 %v2381_v27 }
 0x42d   :  { %1002 = vmatpush1.msra.mxu0 %v2384_v28  ;;  %1073 = vmatpush1.msra.mxu1 %v2387_v29 }
 0x42e   :  { %1003 = vmatprep.subr.mxu0 %v2390_v30  ;;  %1074 = vmatprep.subr.mxu1 %v2393_v31 }
 0x42f   :  { %1004 = vmatpush1.msra.mxu0 %v2396_v32  ;;  %1075 = vmatpush1.msra.mxu1 %v2399_v33 }
 0x430   :  { %1005 = vmatprep.subr.mxu0 %v2402_v34  ;;  %1076 = vmatprep.subr.mxu1 %v2405_v35 }
 0x431   :  { %1006 = vmatpush1.msra.mxu0 %v2408_v36  ;;  %1077 = vmatpush1.msra.mxu1 %v2411_v37 }
 0x432   :  { %1007 = vmatprep.subr.mxu0 %v2414_v38  ;;  %1078 = vmatprep.subr.mxu1 %v2417_v39 }
 0x433   :  { %1008 = vmatpush1.msra.mxu0 %v2420_v40  ;;  %1079 = vmatpush1.msra.mxu1 %v2423_v41 }
 0x434   :  { %1009 = vmatprep.subr.mxu0 %v2426_v43  ;;  %1080 = vmatprep.subr.mxu1 %v2429_v55 }
 0x435   :  { %1010 = vmatpush1.msra.mxu0 %v2432_v42  ;;  %1081 = vmatpush1.msra.mxu1 %v1974_v45  ;;  %v2452_v45 = vld [vmem:[#allocation7 + $0x68] sm:$0xff] }
 0x436   :  { %1011 = vmatprep.subr.mxu0 %v2436_v53  ;;  %1082 = vmatprep.subr.mxu1 %v1980_v47  ;;  %2815 = vst [vmem:[#allocation21_spill] sm:$0xff] %v2452_v45  ;;  %v2456_v47 = vld [vmem:[#allocation7 + $0x60] sm:$0xff] }
 0x437   :  { %1012 = vmatpush1.msra.mxu0 %v2440_v63  ;;  %1083 = vmatpush1.msra.mxu1 %v1986_v49  ;;  %2816 = vst [vmem:[#allocation16_spill] sm:$0xff] %v2456_v47  ;;  %v2460_v49 = vld [vmem:[#allocation7 + $0x48] sm:$0xff] }
 0x438   :  { %1013 = vmatprep.subr.mxu0 %v2444_v61  ;;  %1084 = vmatprep.subr.mxu1 %v1992_v51  ;;  %2817 = vst [vmem:[#allocation23_spill] sm:$0xff] %v2460_v49  ;;  %v2464_v51 = vld [vmem:[#allocation7 + $0x40] sm:$0xff] }
 0x439   :  { %1014 = vmatpush1.msra.mxu0 %v2448_v44  ;;  %1085 = vmatpush1.msra.mxu1 %v2794_v3  ;;  %2818 = vst [vmem:[#allocation17_spill] sm:$0xff] %v2464_v51  ;;  %v2468_v3 = vld [vmem:[#allocation7 + $0x28] sm:$0xff] }
 0x43a   :  { %1015 = vmatprep.subr.mxu0 %v2452_v45  ;;  %1086 = vmatprep.subr.mxu1 %v2796_v5  ;;  %2819 = vst [vmem:[#allocation25_spill] sm:$0xff] %v2468_v3  ;;  %v2481_v5 = vld [vmem:[#allocation7 + $0x1f8] sm:$0xff] }
 0x43b   :  { %1016 = vmatpush1.msra.mxu0 %v2456_v47  ;;  %1087 = vmatpush1.msra.mxu1 %v2798_v7  ;;  %2820 = vst [vmem:[#allocation18_spill] sm:$0xff] %v2481_v5  ;;  %v812_v7 = vld [vmem:[#allocation4 + $0x80] sm:$0xff] }
 0x43c   :  { %1017 = vmatprep.subr.mxu0 %v2460_v49  ;;  %1088 = vmatprep.subr.mxu1 %v2800_v10 }
 0x43d   :  { %1018 = vmatpush1.msra.mxu0 %v2464_v51  ;;  %1089 = vmatpush1.msra.mxu1 %v2802_v12  ;;  %v813_v12 = vld [vmem:[#allocation4 + $0x88] sm:$0xff] }
 0x43e   :  { %1019 = vmatprep.subr.mxu0 %v2468_v3  ;;  %1090 = vmatprep.subr.mxu1 %v2804_v14 }
 0x43f   :  { %1020 = vmatpush1.msra.mxu0 %v2805_v15  ;;  %1091 = vmatpush1.msra.mxu1 %v2806_v16 }
 0x440   :  { %1021 = vmatprep.subr.mxu0 %v2807_v17  ;;  %1092 = vmatprep.subr.mxu1 %v2808_v18 }
 0x441   :  { %1022 = vmatpush1.msra.mxu0 %v2809_v19  ;;  %1055 = vmatprep.mubr.f32.mxu0 %v2810_v20 }
 0x442   :  { %1093 = vmatpush1.msra.mxu1 %v2811_v21  ;;  %1126 = vmatprep.mubr.f32.mxu1 %v2810_v20  ;;  %v815_v21 = vld [vmem:[#allocation4 + $0x98] sm:$0xff] }
 0x443   :  { %1166 = vmatprep.subr.mxu0 %v2316_v22  ;;  %1237 = vmatprep.subr.mxu1 %v2481_v5 }
 0x4e2   :  { %v882_v10 = vpop.f32.mrf.mxu0  ;;  %v953_v18 = vpop.f32.mrf.mxu1 }
 0x4e3   :  { %v958_v14 = vadd.f32 %v882_v10, %v812_v7  ;;  %v960_v20 = vadd.f32 %v953_v18, %v814_v0  ;;  %v2553_v0 = vld [vmem:[#allocation7 + $0x58] sm:$0xff] }
 0x4e4   :  { %v884_v15 = vpop.f32.mrf.mxu0  ;;  %v955_v54 = vpop.f32.mrf.mxu1  ;;  %2824 = vst [vmem:[#allocation20_spill] sm:$0xff] %v2553_v0 }
 0x4e5   :  { %v1542_v16 = vmul.f32 -1.442695, %v958_v14  ;;  %v959_v17 = vadd.f32 %v884_v15, %v813_v12  ;;  %v961_v58 = vadd.f32 %v955_v54, %v815_v21  ;;  %v2545_v54 = vld [vmem:[#allocation7 + $0x78] sm:$0xff] }
 0x4e6   :  { %2822 = vst [vmem:[#allocation19_spill] sm:$0xff] %v2545_v54 }
 0x4e7   :  { %1624 = vpow2.f32 %v1542_v16  ;;  %v1543_v19 = vmul.f32 -1.442695, %v959_v17  ;;  %v1544_v1 = vmul.f32 -1.442695, %v961_v58  ;;  %v2549_v58 = vld [vmem:[#allocation7 + $0x70] sm:$0xff] }
 0x4e8   :  { %2823 = vst [vmem:[#allocation28_spill] sm:$0xff] %v2549_v58 }
 0x4e9   :  { %1626 = vpow2.f32 %v1543_v19 }
 0x4ea   :  { %1628 = vpow2.f32 %v1544_v1  ;;  %v2825_v1 = vld [vmem:[#allocation17_spill] sm:$0xff] }
 0x4f4   :  { %v1625_v22 = vpop.eup %1624 }
 0x4f5   :  { %v965_v3 = vadd.f32 1.0, %v1625_v22 }
 0x4f6   :  { %v1627_v5 = vpop.eup %1626 }
 0x4f7   :  { %1630 = vrcp.f32 %v965_v3  ;;  %v971_v51 = vadd.f32 1.0, %v1627_v5  ;;  %v1629_v7 = vpop.eup %1628  ;;  %v2537_v3 = vld [vmem:[#allocation7 + $0x98] sm:$0xff]  ;;  %v2541_v5 = vld [vmem:[#allocation7 + $0x90] sm:$0xff] }
 0x4f8   :  { %1632 = vtanh.f32 %v960_v20  ;;  %v978_v15 = vadd.f32 1.0, %v1629_v7  ;;  %v2525_v20 = vld [vmem:[#allocation7 + $0xd0] sm:$0xff]  ;;  %2821 = vst [vmem:[#allocation27_spill] sm:$0xff] %v2541_v5 }
 0x4f9   :  { %1634 = vrcp.f32 %v971_v51  ;;  %v2533_v51 = vld [vmem:[#allocation7 + $0xb0] sm:$0xff] }
 0x4fa   :  { %1636 = vrcp.f32 %v978_v15  ;;  %v2557_v7 = vld [vmem:[#allocation7 + $0x50] sm:$0xff] }
 0x4fb   :  { %2826 = vst [vmem:[#allocation29_spill] sm:$0xff] %v2557_v7  ;;  %v2567_v15 = vld [vmem:[#allocation7 + $0x30] sm:$0xff] }
 0x4fc   :  { %2830 = vst [vmem:[#allocation24_spill] sm:$0xff] %v2567_v15 }
 0x504   :  { %v1631_v10 = vpop.eup %1630 }
 0x505   :  { %v1633_v12 = vpop.eup %1632 }
 0x506   :  { %v1635_v14 = vpop.eup %1634  ;;  %v982_v16 = vmul.f32 %v1633_v12, %v1631_v10  ;;  %v2827_v10 = vld [vmem:[#allocation25_spill] sm:$0xff]  ;;  %v2561_v12 = vld [vmem:[#allocation7 + $0x38] sm:$0xff] }
 0x507   :  { %v981_v17 = vmul.f32 %v1635_v14, %v2321_v57  ;;  %v1637_v22 = vpop.eup %1636  ;;  %v2529_v57 = vld [vmem:[#allocation7 + $0xb8] sm:$0xff]  ;;  %2828 = vst [vmem:[#allocation22_spill] sm:$0xff] %v2561_v12  ;;  %v2564_v14 = vld [vmem:[#allocation7 + $0x20] sm:$0xff] }
 0x508   :  { %2829 = vst [vmem:[#allocation30_spill] sm:$0xff] %v2564_v14 }
 0x509   :  { %v2485_v19 = vadd.f32 %v982_v16, %v981_v17  ;;  %v2570_v16 = vld [vmem:[#allocation7 + $0x8] sm:$0xff]  ;;  %v2573_v17 = vld [vmem:[#allocation7 + $0x18] sm:$0xff] }
 0x50a   :  { %2831 = vst [vmem:[#allocation31_spill] sm:$0xff] %v2570_v16  ;;  %2832 = vst [vmem:[#allocation26_spill] sm:$0xff] %v2573_v17 }
 0x50b   :  { %1638 = vtanh.f32 %v2485_v19 }
 0x518   :  { %v1639_v18 = vpop.eup %1638 }
 0x519   :  { %v985_v21 = vmul.f32 %v1639_v18, %v1637_v22  ;;  %v2576_v22 = vld [vmem:[#allocation7] sm:$0xff]  ;;  %v2834_v18 = vmov 0.0  }
 0x51a   :  { %2833 = vst [vmem:[#allocation32_spill] sm:$0xff] %v2576_v22 }
 0x51b   :  { %1056 = vmatmul.mubr.f32.vlgmr.msra.gmra.mxu0 %v985_v21  ;;  %1127 = vmatmul.mubr.f32.vlgmr.msra.gmra.mxu1 %v985_v21  ;;  %v2580_v21 = vld [vmem:[#allocation7 + $0x10] sm:$0xff] }
 0x51c   :  { %1167 = vmatpush1.msra.mxu0 %v2324_v48  ;;  %1238 = vmatpush1.msra.mxu1 %v2327_v50  ;;  %2835 = vst [vmem:[#allocation14_spill] sm:$0xff] %v2580_v21 }
 0x51d   :  { %1168 = vmatprep.subr.mxu0 %v2330_v46  ;;  %1239 = vmatprep.subr.mxu1 %v2333_v59 }
 0x51e   :  { %1169 = vmatpush1.msra.mxu0 %v2336_v60  ;;  %1240 = vmatpush1.msra.mxu1 %v2339_v52 }
 0x51f   :  { %1170 = vmatprep.subr.mxu0 %v2342_v9  ;;  %1241 = vmatprep.subr.mxu1 %v2345_v56 }
 0x520   :  { %1171 = vmatpush1.msra.mxu0 %v2348_v62  ;;  %1242 = vmatpush1.msra.mxu1 %v2351_v2 }
 0x521   :  { %1172 = vmatprep.subr.mxu0 %v2354_v4  ;;  %1243 = vmatprep.subr.mxu1 %v2357_v6 }
 0x522   :  { %1173 = vmatpush1.msra.mxu0 %v2360_v8  ;;  %1244 = vmatpush1.msra.mxu1 %v2363_v11 }
 0x523   :  { %1174 = vmatprep.subr.mxu0 %v2366_v13  ;;  %1245 = vmatprep.subr.mxu1 %v2369_v23 }
 0x524   :  { %1175 = vmatpush1.msra.mxu0 %v2372_v24  ;;  %1246 = vmatpush1.msra.mxu1 %v2375_v25 }
 0x525   :  { %1176 = vmatprep.subr.mxu0 %v2378_v26  ;;  %1247 = vmatprep.subr.mxu1 %v2381_v27 }
 0x526   :  { %1177 = vmatpush1.msra.mxu0 %v2384_v28  ;;  %1248 = vmatpush1.msra.mxu1 %v2387_v29 }
 0x527   :  { %1178 = vmatprep.subr.mxu0 %v2390_v30  ;;  %1249 = vmatprep.subr.mxu1 %v2393_v31 }
 0x528   :  { %1179 = vmatpush1.msra.mxu0 %v2396_v32  ;;  %1250 = vmatpush1.msra.mxu1 %v2399_v33 }
 0x529   :  { %1180 = vmatprep.subr.mxu0 %v2402_v34  ;;  %1251 = vmatprep.subr.mxu1 %v2405_v35 }
 0x52a   :  { %1181 = vmatpush1.msra.mxu0 %v2408_v36  ;;  %1252 = vmatpush1.msra.mxu1 %v2411_v37 }
 0x52b   :  { %1182 = vmatprep.subr.mxu0 %v2414_v38  ;;  %1253 = vmatprep.subr.mxu1 %v2417_v39 }
 0x52c   :  { %1183 = vmatpush1.msra.mxu0 %v2420_v40  ;;  %1254 = vmatpush1.msra.mxu1 %v2423_v41 }
 0x52d   :  { %1184 = vmatprep.subr.mxu0 %v2426_v43  ;;  %1255 = vmatprep.subr.mxu1 %v2429_v55 }
 0x52e   :  { %1185 = vmatpush1.msra.mxu0 %v2432_v42  ;;  %1256 = vmatpush1.msra.mxu1 %v2525_v20 }
 0x52f   :  { %1186 = vmatprep.subr.mxu0 %v2436_v53  ;;  %1257 = vmatprep.subr.mxu1 %v2529_v57 }
 0x530   :  { %1187 = vmatpush1.msra.mxu0 %v2440_v63  ;;  %1258 = vmatpush1.msra.mxu1 %v2533_v51 }
 0x531   :  { %1188 = vmatprep.subr.mxu0 %v2444_v61  ;;  %1259 = vmatprep.subr.mxu1 %v2537_v3 }
 0x532   :  { %1189 = vmatpush1.msra.mxu0 %v2448_v44  ;;  %1260 = vmatpush1.msra.mxu1 %v2541_v5 }
 0x533   :  { %1190 = vmatprep.subr.mxu0 %v2452_v45  ;;  %1261 = vmatprep.subr.mxu1 %v2545_v54  ;;  %v989_v54 = vld [vmem:[#allocation4 + $0xb0] sm:$0xff] }
 0x534   :  { %1191 = vmatpush1.msra.mxu0 %v2456_v47  ;;  %1262 = vmatpush1.msra.mxu1 %v2549_v58  ;;  %v990_v58 = vld [vmem:[#allocation4 + $0xb8] sm:$0xff] }
 0x535   :  { %1192 = vmatprep.subr.mxu0 %v2460_v49  ;;  %1263 = vmatprep.subr.mxu1 %v2553_v0 }
 0x536   :  { %1193 = vmatpush1.msra.mxu0 %v2825_v1  ;;  %1264 = vmatpush1.msra.mxu1 %v2557_v7 }
 0x537   :  { %1194 = vmatprep.subr.mxu0 %v2827_v10  ;;  %1265 = vmatprep.subr.mxu1 %v2561_v12  ;;  %v988_v10 = vld [vmem:[#allocation4 + $0xa8] sm:$0xff] }
 0x538   :  { %1195 = vmatpush1.msra.mxu0 %v2564_v14  ;;  %1266 = vmatpush1.msra.mxu1 %v2567_v15  ;;  %v2836_v15 = vld [vmem:[#allocation13_spill] sm:$0xff]  ;;  %v2837_v14 = vld [vmem:[#allocation18_spill] sm:$0xff] }
 0x539   :  { %1196 = vmatprep.subr.mxu0 %v2570_v16  ;;  %1267 = vmatprep.subr.mxu1 %v2573_v17  ;;  %v987_v16 = vld [vmem:[#allocation4 + $0xa0] sm:$0xff] }
 0x53a   :  { %1197 = vmatpush1.msra.mxu0 %v2576_v22  ;;  %1230 = vmatprep.mubr.f32.mxu0 %v2834_v18 }
 0x53b   :  { %1268 = vmatpush1.msra.mxu1 %v2580_v21  ;;  %1301 = vmatprep.mubr.f32.mxu1 %v2834_v18 }
 0x53c   :  { %1341 = vmatprep.subr.mxu0 %v2836_v15  ;;  %1412 = vmatprep.subr.mxu1 %v2837_v14 }
 0x5db   :  { %v1057_v12 = vpop.f32.mrf.mxu0  ;;  %v1128_v22 = vpop.f32.mrf.mxu1 }
 0x5dc   :  { %v1133_v17 = vadd.f32 %v1057_v12, %v987_v16  ;;  %v1135_v15 = vadd.f32 %v1128_v22, %v989_v54 }
 0x5dd   :  { %v1059_v7 = vpop.f32.mrf.mxu0  ;;  %v1130_v47 = vpop.f32.mrf.mxu1 }
 0x5de   :  { %v1545_v1 = vmul.f32 -1.442695, %v1133_v17  ;;  %v1134_v0 = vadd.f32 %v1059_v7, %v988_v10  ;;  %v1136_v21 = vadd.f32 %v1130_v47, %v990_v58 }
 0x5e0   :  { %1640 = vpow2.f32 %v1545_v1  ;;  %v1546_v49 = vmul.f32 -1.442695, %v1134_v0  ;;  %v1547_v18 = vmul.f32 -1.442695, %v1136_v21 }
 0x5e2   :  { %1642 = vpow2.f32 %v1546_v49 }
 0x5e3   :  { %1644 = vpow2.f32 %v1547_v18  ;;  %v1337_v18 = vld [vmem:[#allocation4 + $0xe0] sm:$0xff] }
 0x5ed   :  { %v1641_v45 = vpop.eup %1640 }
 0x5ee   :  { %v1140_v5 = vadd.f32 1.0, %v1641_v45 }
 0x5ef   :  { %v1643_v14 = vpop.eup %1642 }
 0x5f0   :  { %1646 = vrcp.f32 %v1140_v5  ;;  %v1146_v44 = vadd.f32 1.0, %v1643_v14  ;;  %v1645_v12 = vpop.eup %1644 }
 0x5f1   :  { %1648 = vtanh.f32 %v1135_v15  ;;  %v1153_v0 = vadd.f32 1.0, %v1645_v12  ;;  %v1338_v15 = vld [vmem:[#allocation4 + $0xe8] sm:$0xff] }
 0x5f2   :  { %1650 = vrcp.f32 %v1146_v44 }
 0x5f3   :  { %1652 = vrcp.f32 %v1153_v0 }
 0x5fd   :  { %v1647_v7 = vpop.eup %1646 }
 0x5fe   :  { %v1649_v1 = vpop.eup %1648 }
 0x5ff   :  { %v1651_v10 = vpop.eup %1650  ;;  %v1157_v49 = vmul.f32 %v1649_v1, %v1647_v7 }
 0x600   :  { %v1156_v16 = vmul.f32 %v1651_v10, %v2485_v19  ;;  %v1653_v45 = vpop.eup %1652 }
 0x602   :  { %v2587_v47 = vadd.f32 %v1157_v49, %v1156_v16  ;;  %v1340_v49 = vld [vmem:[#allocation4 + $0xf8] sm:$0xff] }
 0x604   :  { %1654 = vtanh.f32 %v2587_v47 }
 0x611   :  { %v1655_v54 = vpop.eup %1654 }
 0x612   :  { %v1160_v58 = vmul.f32 %v1655_v54, %v1653_v45  ;;  %v1339_v45 = vld [vmem:[#allocation4 + $0xf0] sm:$0xff] }
 0x614   :  { %1231 = vmatmul.mubr.f32.vlgmr.msra.gmra.mxu0 %v1160_v58  ;;  %1302 = vmatmul.mubr.f32.vlgmr.msra.gmra.mxu1 %v1160_v58 }
 0x615   :  { %1342 = vmatpush1.msra.mxu0 %v2324_v48  ;;  %1413 = vmatpush1.msra.mxu1 %v2327_v50  ;;  %v2838_v48 = vld [vmem:[#allocation15_spill] sm:$0xff] }
 0x616   :  { %1343 = vmatprep.subr.mxu0 %v2330_v46  ;;  %1414 = vmatprep.subr.mxu1 %v2333_v59  ;;  %v2839_v50 = vld [vmem:[#allocation27_spill] sm:$0xff]  ;;  %v2840_v46 = vld [vmem:[#allocation21_spill] sm:$0xff] }
 0x617   :  { %1344 = vmatpush1.msra.mxu0 %v2336_v60  ;;  %1415 = vmatpush1.msra.mxu1 %v2339_v52  ;;  %v2841_v59 = vld [vmem:[#allocation19_spill] sm:$0xff]  ;;  %v2842_v60 = vld [vmem:[#allocation16_spill] sm:$0xff] }
 0x618   :  { %1345 = vmatprep.subr.mxu0 %v2342_v9  ;;  %1416 = vmatprep.subr.mxu1 %v2345_v56  ;;  %v2843_v52 = vld [vmem:[#allocation28_spill] sm:$0xff]  ;;  %v2844_v9 = vld [vmem:[#allocation23_spill] sm:$0xff] }
 0x619   :  { %1346 = vmatpush1.msra.mxu0 %v2348_v62  ;;  %1417 = vmatpush1.msra.mxu1 %v2351_v2  ;;  %v2845_v56 = vld [vmem:[#allocation20_spill] sm:$0xff]  ;;  %v2846_v62 = vld [vmem:[#allocation17_spill] sm:$0xff] }
 0x61a   :  { %1347 = vmatprep.subr.mxu0 %v2354_v4  ;;  %1418 = vmatprep.subr.mxu1 %v2357_v6  ;;  %v2847_v2 = vld [vmem:[#allocation29_spill] sm:$0xff]  ;;  %v2849_v6 = vld [vmem:[#allocation22_spill] sm:$0xff] }
 0x61b   :  { %1348 = vmatpush1.msra.mxu0 %v2360_v8  ;;  %1419 = vmatpush1.msra.mxu1 %v2363_v11  ;;  %v2848_v4 = vld [vmem:[#allocation25_spill] sm:$0xff]  ;;  %v2850_v8 = vld [vmem:[#allocation30_spill] sm:$0xff]  ;;  %v2851_v11 = vld [vmem:[#allocation24_spill] sm:$0xff] }
 0x61c   :  { %1349 = vmatprep.subr.mxu0 %v2366_v13  ;;  %1420 = vmatprep.subr.mxu1 %v2369_v23  ;;  %v2852_v13 = vld [vmem:[#allocation31_spill] sm:$0xff]  ;;  %v2853_v23 = vld [vmem:[#allocation26_spill] sm:$0xff] }
 0x61d   :  { %1350 = vmatpush1.msra.mxu0 %v2372_v24  ;;  %1421 = vmatpush1.msra.mxu1 %v2375_v25  ;;  %v2854_v24 = vld [vmem:[#allocation32_spill] sm:$0xff]  ;;  %v2855_v25 = vmov 0.0  }
 0x61e   :  { %1351 = vmatprep.subr.mxu0 %v2378_v26  ;;  %1422 = vmatprep.subr.mxu1 %v2381_v27  ;;  %v2856_v26 = vld [vmem:[#allocation14_spill] sm:$0xff]  ;;  %v1162_v27 = vld [vmem:[#allocation4 + $0xc0] sm:$0xff] }
 0x61f   :  { %1352 = vmatpush1.msra.mxu0 %v2384_v28  ;;  %1423 = vmatpush1.msra.mxu1 %v2387_v29  ;;  %v1163_v29 = vld [vmem:[#allocation4 + $0xc8] sm:$0xff] }
 0x620   :  { %1353 = vmatprep.subr.mxu0 %v2390_v30  ;;  %1424 = vmatprep.subr.mxu1 %v2393_v31 }
 0x621   :  { %1354 = vmatpush1.msra.mxu0 %v2396_v32  ;;  %1425 = vmatpush1.msra.mxu1 %v2399_v33 }
 0x622   :  { %1355 = vmatprep.subr.mxu0 %v2402_v34  ;;  %1426 = vmatprep.subr.mxu1 %v2405_v35 }
 0x623   :  { %1356 = vmatpush1.msra.mxu0 %v2408_v36  ;;  %1427 = vmatpush1.msra.mxu1 %v2411_v37  ;;  %v1165_v36 = vld [vmem:[#allocation4 + $0xd8] sm:$0xff] }
 0x624   :  { %1357 = vmatprep.subr.mxu0 %v2414_v38  ;;  %1428 = vmatprep.subr.mxu1 %v2417_v39  ;;  %v1164_v39 = vld [vmem:[#allocation4 + $0xd0] sm:$0xff] }
 0x625   :  { %1358 = vmatpush1.msra.mxu0 %v2420_v40  ;;  %1429 = vmatpush1.msra.mxu1 %v2423_v41 }
 0x626   :  { %1359 = vmatprep.subr.mxu0 %v2426_v43  ;;  %1430 = vmatprep.subr.mxu1 %v2429_v55 }
 0x627   :  { %1360 = vmatpush1.msra.mxu0 %v2432_v42  ;;  %1431 = vmatpush1.msra.mxu1 %v2525_v20 }
 0x628   :  { %1361 = vmatprep.subr.mxu0 %v2436_v53  ;;  %1432 = vmatprep.subr.mxu1 %v2529_v57 }
 0x629   :  { %1362 = vmatpush1.msra.mxu0 %v2440_v63  ;;  %1433 = vmatpush1.msra.mxu1 %v2533_v51 }
 0x62a   :  { %1363 = vmatprep.subr.mxu0 %v2444_v61  ;;  %1434 = vmatprep.subr.mxu1 %v2537_v3 }
 0x62b   :  { %1364 = vmatpush1.msra.mxu0 %v2838_v48  ;;  %1435 = vmatpush1.msra.mxu1 %v2839_v50 }
 0x62c   :  { %1365 = vmatprep.subr.mxu0 %v2840_v46  ;;  %1436 = vmatprep.subr.mxu1 %v2841_v59 }
 0x62d   :  { %1366 = vmatpush1.msra.mxu0 %v2842_v60  ;;  %1437 = vmatpush1.msra.mxu1 %v2843_v52 }
 0x62e   :  { %1367 = vmatprep.subr.mxu0 %v2844_v9  ;;  %1438 = vmatprep.subr.mxu1 %v2845_v56 }
 0x62f   :  { %1368 = vmatpush1.msra.mxu0 %v2846_v62  ;;  %1439 = vmatpush1.msra.mxu1 %v2847_v2 }
 0x630   :  { %1369 = vmatprep.subr.mxu0 %v2848_v4  ;;  %1440 = vmatprep.subr.mxu1 %v2849_v6 }
 0x631   :  { %1370 = vmatpush1.msra.mxu0 %v2850_v8  ;;  %1441 = vmatpush1.msra.mxu1 %v2851_v11 }
 0x632   :  { %1371 = vmatprep.subr.mxu0 %v2852_v13  ;;  %1442 = vmatprep.subr.mxu1 %v2853_v23 }
 0x633   :  { %1372 = vmatpush1.msra.mxu0 %v2854_v24  ;;  %1405 = vmatprep.mubr.f32.mxu0 %v2855_v25 }
 0x634   :  { %1443 = vmatpush1.msra.mxu1 %v2856_v26  ;;  %1476 = vmatprep.mubr.f32.mxu1 %v2855_v25 }
 0x6d4   :  { %v1232_v28 = vpop.f32.mrf.mxu0  ;;  %v1303_v34 = vpop.f32.mrf.mxu1 }
 0x6d5   :  { %v1308_v30 = vadd.f32 %v1232_v28, %v1162_v27  ;;  %v1310_v43 = vadd.f32 %v1303_v34, %v1164_v39 }
 0x6d6   :  { %v1234_v31 = vpop.f32.mrf.mxu0  ;;  %v1305_v37 = vpop.f32.mrf.mxu1 }
 0x6d7   :  { %v1548_v32 = vmul.f32 -1.442695, %v1308_v30  ;;  %v1309_v33 = vadd.f32 %v1234_v31, %v1163_v29  ;;  %v1311_v38 = vadd.f32 %v1305_v37, %v1165_v36 }
 0x6d9   :  { %1656 = vpow2.f32 %v1548_v32  ;;  %v1549_v35 = vmul.f32 -1.442695, %v1309_v33  ;;  %v1550_v40 = vmul.f32 -1.442695, %v1311_v38 }
 0x6db   :  { %1658 = vpow2.f32 %v1549_v35 }
 0x6dc   :  { %1660 = vpow2.f32 %v1550_v40 }
 0x6e6   :  { %v1657_v41 = vpop.eup %1656 }
 0x6e7   :  { %v1315_v55 = vadd.f32 1.0, %v1657_v41 }
 0x6e8   :  { %v1659_v42 = vpop.eup %1658 }
 0x6e9   :  { %1662 = vrcp.f32 %v1315_v55  ;;  %v1321_v53 = vadd.f32 1.0, %v1659_v42  ;;  %v1661_v63 = vpop.eup %1660 }
 0x6ea   :  { %1664 = vtanh.f32 %v1310_v43  ;;  %v1328_v20 = vadd.f32 1.0, %v1661_v63 }
 0x6eb   :  { %1666 = vrcp.f32 %v1321_v53 }
 0x6ec   :  { %1668 = vrcp.f32 %v1328_v20 }
 0x6f6   :  { %v1663_v61 = vpop.eup %1662 }
 0x6f7   :  { %v1665_v44 = vpop.eup %1664 }
 0x6f8   :  { %v1667_v19 = vpop.eup %1666  ;;  %v1332_v57 = vmul.f32 %v1665_v44, %v1663_v61 }
 0x6f9   :  { %v1331_v51 = vmul.f32 %v1667_v19, %v2587_v47  ;;  %v1669_v5 = vpop.eup %1668 }
 0x6fb   :  { %v1333_v3 = vadd.f32 %v1332_v57, %v1331_v51 }
 0x6fd   :  { %1670 = vtanh.f32 %v1333_v3 }
 0x70a   :  { %v1671_v17 = vpop.eup %1670 }
 0x70b   :  { %v1335_v22 = vmul.f32 %v1671_v17, %v1669_v5 }
 0x70d   :  { %1406 = vmatmul.mubr.f32.vlgmr.msra.gmra.mxu0 %v1335_v22  ;;  %1477 = vmatmul.mubr.f32.vlgmr.msra.gmra.mxu1 %v1335_v22 }
 0x7cd   :  { %v1407_v21 = vpop.f32.mrf.mxu0  ;;  %v1478_v10 = vpop.f32.mrf.mxu1 }
 0x7ce   :  { %v1483_v14 = vadd.f32 %v1407_v21, %v1337_v18  ;;  %v1485_v48 = vadd.f32 %v1478_v10, %v1339_v45 }
 0x7cf   :  { %v1409_v12 = vpop.f32.mrf.mxu0  ;;  %v1480_v16 = vpop.f32.mrf.mxu1 }
 0x7d0   :  { %v1551_v7 = vmul.f32 -1.442695, %v1483_v14  ;;  %v1484_v1 = vadd.f32 %v1409_v12, %v1338_v15  ;;  %v1486_v47 = vadd.f32 %v1480_v16, %v1340_v49 }
 0x7d2   :  { %1672 = vpow2.f32 %v1551_v7  ;;  %v1552_v0 = vmul.f32 -1.442695, %v1484_v1  ;;  %v1553_v54 = vmul.f32 -1.442695, %v1486_v47 }
 0x7d4   :  { %1674 = vpow2.f32 %v1552_v0 }
 0x7d5   :  { %1676 = vpow2.f32 %v1553_v54 }
 0x7df   :  { %v1673_v58 = vpop.eup %1672 }
 0x7e0   :  { %v1490_v50 = vadd.f32 1.0, %v1673_v58 }
 0x7e1   :  { %v1675_v46 = vpop.eup %1674 }
 0x7e2   :  { %1678 = vrcp.f32 %v1490_v50  ;;  %v1496_v59 = vadd.f32 1.0, %v1675_v46  ;;  %v1677_v60 = vpop.eup %1676 }
 0x7e3   :  { %1680 = vtanh.f32 %v1485_v48  ;;  %v1503_v62 = vadd.f32 1.0, %v1677_v60 }
 0x7e4   :  { %1682 = vrcp.f32 %v1496_v59 }
 0x7e5   :  { %1684 = vrcp.f32 %v1503_v62 }
 0x7ef   :  { %v1679_v52 = vpop.eup %1678 }
 0x7f0   :  { %v1681_v9 = vpop.eup %1680 }
 0x7f1   :  { %v1683_v56 = vpop.eup %1682  ;;  %v1507_v2 = vmul.f32 %v1681_v9, %v1679_v52 }
 0x7f2   :  { %v1506_v4 = vmul.f32 %v1683_v56, %v1333_v3  ;;  %v1685_v8 = vpop.eup %1684 }
 0x7f4   :  { %v1508_v6 = vadd.f32 %v1507_v2, %v1506_v4 }
 0x7f6   :  { %1686 = vtanh.f32 %v1508_v6 }
 0x803   :  { %v1687_v11 = vpop.eup %1686 }
 0x804   :  { %v1510_v13 = vmul.f32 %v1687_v11, %v1685_v8 }
 0x806   :  { %1513 = vst [vmem:[#allocation9] sm:$0xff] %v1510_v13 }
 0x807   :  { %1803 = shalt.err (!%p1800_p0)
}
 0x808   :  { %1523 = dma.vmem_to_hbm [thread:$0]  %s1521_s1, 128, %s2660_s2, [#allocation6]  }
 0x809   :  { %1816 = dma.done.wait [#allocation6], 128  }
 0x80a   :  { %1817 = vsyncadd [#allocation6], 4294967168 }
 0x80b   :  { %1527 = vsyncpa [#allocation5], 1 }
 0x80c   :  { %1528 = vsyncpa [#allocation8], 1 }
 0x80d   :  { %1529 = vsyncpa [#allocation6], 1 }

</bundles_post_ra>
